<compile_context>
chip_gen: v6e
topology: v6e:2x2x1
jax: 0.10.0
libtpu: 0.0.40
codegen_flags: <defaults>
</compile_context>

<pallas_src>
import functools
import math

import jax
import jax.numpy as jnp
from jax.experimental import pallas as pl
from jax.experimental.pallas import tpu as pltpu

_LN_EPS = 1e-5   # torch.nn.LayerNorm default eps


def _vmem_limit_bytes():
    """Scoped-VMEM request gated on the actual chip (v7x has only 64 MiB/TC)."""
    try:
        cap = int(pltpu.get_tpu_info().vmem_capacity_bytes)
    except Exception:  # no info available -> conservative v7x-safe default
        cap = 64 * 1024 * 1024
    return int(min(cap * 3 // 4, 100 * 1024 * 1024))


# ---------------------------------------------------------------------------
# Fused encoder kernel: embedding + num_layers x (attention + LN + FFN + LN)
# ---------------------------------------------------------------------------
def _encoder_kernel(x_ref, wp_ref, posb_ref, wqkv_ref, wo_ref, bo_ref,
                    g1_ref, be1_ref, w1_ref, b1_ref, w2_ref, b2_ref,
                    g2_ref, be2_ref, o_ref, *,
                    heads, head_dim, hidden, num_layers, eps,
                    compute_dtype, approx_recip):
    cd = compute_dtype
    f32 = jnp.float32

    # ---- input embedding: x @ Wproj.T + (b_proj + pos_embed[:S]) ----------
    # TODO(synk): nn.Dropout after the embedding / inside the block is
    # identity here (inference semantics).
    h = jnp.dot(x_ref[0].astype(cd), wp_ref[...],
                preferred_element_type=f32) + posb_ref[...]          # (S, H) f32

    def layer_body(_, h):
        # Fused block-diagonal QKV projection: one (S, H) @ (H, 3H) matmul,
        # H-major (lane-dense) throughout; 1/sqrt(hidden) is already folded
        # into the Q blocks of the weight.
        qkv = jnp.dot(h.astype(cd), wqkv_ref[...],
                      preferred_element_type=f32)                    # (S, 3H)
        q = qkv[:, :hidden]
        k = qkv[:, hidden:2 * hidden]
        v = qkv[:, 2 * hidden:]

        # Per-head attention (heads is small & static -> trace-time unrolled).
        # Per-head outputs are re-packed lane-dense so fc_out is a single
        # (S, H) @ (H, H) matmul (no per-head partials / heads reduction).
        outs = []
        for hh in range(heads):
            sl = slice(hh * head_dim, (hh + 1) * head_dim)
            qh = q[:, sl].astype(cd)
            kh = k[:, sl].astype(cd)
            vh = v[:, sl].astype(cd)
            sc = jnp.einsum('qd,kd->qk', qh, kh,
                            preferred_element_type=f32)              # (S, S)
            # TODO(synk): optional attention `mask` not implemented
            # (reference path uses mask=None).
            sc = sc - jnp.max(sc, axis=-1, keepdims=True)
            p = jnp.exp(sc)
            p = p * pl.reciprocal(jnp.sum(p, axis=-1, keepdims=True),
                                  approx=approx_recip)
            outs.append(jnp.einsum('qk,kd->qd', p.astype(cd), vh,
                                   preferred_element_type=f32))      # (S, D)
        o_cat = jnp.concatenate(outs, axis=-1)                       # (S, H)

        attn = jnp.dot(o_cat.astype(cd), wo_ref[...],
                       preferred_element_type=f32) + bo_ref[...]

        # Residual + LayerNorm 1 (f32).
        h1 = attn + h
        mu1 = jnp.mean(h1, axis=-1, keepdims=True)
        var1 = jnp.mean(jnp.square(h1 - mu1), axis=-1, keepdims=True)
        h1 = (h1 - mu1) * jax.lax.rsqrt(var1 + eps) * g1_ref[...] + be1_ref[...]

        # Feed-forward: Linear -> ReLU -> Linear (f32 accumulation).
        ffn = jnp.dot(h1.astype(cd), w1_ref[...],
                      preferred_element_type=f32) + b1_ref[...]
        ffn = jnp.maximum(ffn, 0.0)
        ffn = jnp.dot(ffn.astype(cd), w2_ref[...],
                      preferred_element_type=f32) + b2_ref[...]

        # Residual + LayerNorm 2 (f32).
        h2 = ffn + h1
        mu2 = jnp.mean(h2, axis=-1, keepdims=True)
        var2 = jnp.mean(jnp.square(h2 - mu2), axis=-1, keepdims=True)
        return (h2 - mu2) * jax.lax.rsqrt(var2 + eps) * g2_ref[...] + be2_ref[...]

    # ModuleList([Transformer_block(...)] * num_layers) shares ONE module
    # instance -> all layers use the same weights; loop in-kernel.
    h = jax.lax.fori_loop(0, num_layers, layer_body, h)
    o_ref[0] = h.astype(o_ref.dtype)


# ---------------------------------------------------------------------------
# Wrapper: weight prep + pallas_call
# ---------------------------------------------------------------------------
def encoder_forward(x, params, *, heads, num_layers,
                    compute_dtype=jnp.bfloat16, approx_softmax_recip=False,
                    out_dtype=jnp.float32):
    """Pallas-backed Encoder.forward(x) (inference: dropout == identity)."""
    n, seq, in_dim = x.shape
    hidden = params["w_proj"].shape[0]
    head_dim = hidden // heads
    assert head_dim * heads == hidden, "hidden must be divisible by heads"
    ff = params["w1"].shape[0]
    assert seq <= params["pos_table"].shape[0], \
        "sequence length exceeds the position-embedding table"
    cd = compute_dtype

    # --- weight prep (torch Linear stores (out_features, in_features)) -----
    scale = 1.0 / math.sqrt(hidden)        # PyTorch scales by sqrt(hidden_size)
    eye = jnp.eye(heads, dtype=jnp.float32)
    # Block-diagonal per-head projections, fused along the output dim and with
    # the softmax scale folded into the Q block.
    wqkv = jnp.concatenate(
        [jnp.kron(eye, params["wq"].T.astype(jnp.float32)) * scale,
         jnp.kron(eye, params["wk"].T.astype(jnp.float32)),
         jnp.kron(eye, params["wv"].T.astype(jnp.float32))],
        axis=1).astype(cd)                                      # (H, 3H)

    wp_t = params["w_proj"].T.astype(cd)                        # (IN, H)
    posb = (params["pos_table"][:seq].astype(jnp.float32)
            + params["b_proj"].astype(jnp.float32)[None, :])    # (S, H)
    wo_t = params["wo"].T.astype(cd)                            # (H, H)
    bo = params["bo"].reshape(1, hidden).astype(jnp.float32)
    g1 = params["ln1_g"].reshape(1, hidden).astype(jnp.float32)
    be1 = params["ln1_b"].reshape(1, hidden).astype(jnp.float32)
    w1_t = params["w1"].T.astype(cd)                            # (H, FF)
    b1 = params["b1"].reshape(1, ff).astype(jnp.float32)
    w2_t = params["w2"].T.astype(cd)                            # (FF, H)
    b2 = params["b2"].reshape(1, hidden).astype(jnp.float32)
    g2 = params["ln2_g"].reshape(1, hidden).astype(jnp.float32)
    be2 = params["ln2_b"].reshape(1, hidden).astype(jnp.float32)

    kernel = functools.partial(
        _encoder_kernel, heads=heads, head_dim=head_dim, hidden=hidden,
        num_layers=num_layers, eps=_LN_EPS, compute_dtype=cd,
        approx_recip=approx_softmax_recip)

    inv = lambda b: (0, 0)   # grid-invariant operands (DMA'd once, then reused)

    return pl.pallas_call(
        kernel,
        out_shape=jax.ShapeDtypeStruct((n, seq, hidden), out_dtype),
        grid_spec=pl.GridSpec(
            grid=(n,),
            in_specs=[
                pl.BlockSpec((1, seq, in_dim), lambda b: (b, 0, 0)),   # x
                pl.BlockSpec((in_dim, hidden), inv),                   # Wproj.T
                pl.BlockSpec((seq, hidden), inv),                      # pos + b_proj
                pl.BlockSpec((hidden, 3 * hidden), inv),               # fused QKV (block-diag)
                pl.BlockSpec((hidden, hidden), inv),                   # Wo.T
                pl.BlockSpec((1, hidden), inv),                        # bo
                pl.BlockSpec((1, hidden), inv),                        # ln1 gamma
                pl.BlockSpec((1, hidden), inv),                        # ln1 beta
                pl.BlockSpec((hidden, ff), inv),                       # W1.T
                pl.BlockSpec((1, ff), inv),                            # b1
                pl.BlockSpec((ff, hidden), inv),                       # W2.T
                pl.BlockSpec((1, hidden), inv),                        # b2
                pl.BlockSpec((1, hidden), inv),                        # ln2 gamma
                pl.BlockSpec((1, hidden), inv),                        # ln2 beta
            ],
            out_specs=pl.BlockSpec((1, seq, hidden), lambda b: (b, 0, 0)),
        ),
        compiler_params=pltpu.CompilerParams(
            dimension_semantics=("parallel",),
            vmem_limit_bytes=_vmem_limit_bytes()),
    )(x, wp_t, posb, wqkv, wo_t, bo, g1, be1, w1_t, b1, w2_t, b2, g2, be2)


# ---------------------------------------------------------------------------
# Pure-JAX reference (mirrors the PyTorch forward, eval mode) for verification
# ---------------------------------------------------------------------------
def _layer_norm_ref(z, gamma, beta, eps=_LN_EPS):
    mu = jnp.mean(z, axis=-1, keepdims=True)
    var = jnp.mean(jnp.square(z - mu), axis=-1, keepdims=True)
    return (z - mu) / jnp.sqrt(var + eps) * gamma + beta


def _reference_encoder(x, params, *, heads, num_layers):
    n, seq, _ = x.shape
    hidden = params["w_proj"].shape[0]
    d = hidden // heads

    h = x @ params["w_proj"].T + params["b_proj"] + params["pos_table"][:seq][None]
    wq, wk, wv = params["wq"], params["wk"], params["wv"]
    wo, bo = params["wo"], params["bo"]
    w1, b1, w2, b2 = params["w1"], params["b1"], params["w2"], params["b2"]
    for _ in range(num_layers):
        q = h.reshape(n, seq, heads, d) @ wq.T
        k = h.reshape(n, seq, heads, d) @ wk.T
        v = h.reshape(n, seq, heads, d) @ wv.T
        w_att = jnp.einsum('nqhd,nkhd->nhqk', q, k)
        w_att = jax.nn.softmax(w_att / math.sqrt(hidden), axis=3)
        att = jnp.einsum('nhqk,nkhd->nqhd', w_att, v).reshape(n, seq, hidden)
        att = att @ wo.T + bo
        z = _layer_norm_ref(att + h, params["ln1_g"], params["ln1_b"])
        f = jnp.maximum(z @ w1.T + b1, 0.0) @ w2.T + b2
        h = _layer_norm_ref(f + z, params["ln2_g"], params["ln2_b"])
    return h


if __name__ == "__main__":
    BATCH, SEQ, HIDDEN, HEADS = 2, 8, 32, 2
    NUM_LAYERS, FORWARD_EXP = 2, 4
    IN_DIM, IMAGE_POS = 2048, 64          # Encoder.linear_proj is Linear(2048, hidden)
    FF = FORWARD_EXP * HIDDEN
    D = HIDDEN // HEADS

    key = jax.random.PRNGKey(0)
    ks = jax.random.split(key, 18)
    x = jax.random.normal(ks[0], (BATCH, SEQ, IN_DIM), dtype=jnp.float32)

    params = dict(
        w_proj=jax.random.normal(ks[1], (HIDDEN, IN_DIM), jnp.float32) * 0.02,
        b_proj=jax.random.normal(ks[2], (HIDDEN,), jnp.float32) * 0.1,
        pos_table=jax.random.normal(ks[3], (IMAGE_POS, HIDDEN), jnp.float32) * 0.1,
        wq=jax.random.normal(ks[4], (D, D), jnp.float32) * 0.2,
        wk=jax.random.normal(ks[5], (D, D), jnp.float32) * 0.2,
        wv=jax.random.normal(ks[6], (D, D), jnp.float32) * 0.2,
        wo=jax.random.normal(ks[7], (HIDDEN, HIDDEN), jnp.float32) * 0.1,
        bo=jax.random.normal(ks[8], (HIDDEN,), jnp.float32) * 0.1,
        ln1_g=1.0 + 0.1 * jax.random.normal(ks[9], (HIDDEN,), jnp.float32),
        ln1_b=0.1 * jax.random.normal(ks[10], (HIDDEN,), jnp.float32),
        w1=jax.random.normal(ks[11], (FF, HIDDEN), jnp.float32) * 0.1,
        b1=jax.random.normal(ks[12], (FF,), jnp.float32) * 0.1,
        w2=jax.random.normal(ks[13], (HIDDEN, FF), jnp.float32) * 0.1,
        b2=jax.random.normal(ks[14], (HIDDEN,), jnp.float32) * 0.1,
        ln2_g=1.0 + 0.1 * jax.random.normal(ks[15], (HIDDEN,), jnp.float32),
        ln2_b=0.1 * jax.random.normal(ks[16], (HIDDEN,), jnp.float32),
    )

    ref = _reference_encoder(x, params, heads=HEADS, num_layers=NUM_LAYERS)

    # f32 compute path — tight correctness check against the pure-JAX reference.
    out_f32 = encoder_forward(x, params, heads=HEADS, num_layers=NUM_LAYERS,
                              compute_dtype=jnp.float32)
    out_f32 = jax.block_until_ready(out_f32)
    assert out_f32.shape == (BATCH, SEQ, HIDDEN)
    assert bool(jnp.all(jnp.isfinite(out_f32)))
    assert jnp.allclose(out_f32, ref, atol=5e-2, rtol=5e-2), "f32 mismatch vs reference"

    # bf16 MXU path (default; recommended for v6e/v7x) — looser check (bf16 rounding).
    out_bf16 = encoder_forward(x, params, heads=HEADS, num_layers=NUM_LAYERS)
    out_bf16 = jax.block_until_ready(out_bf16)
    assert out_bf16.shape == (BATCH, SEQ, HIDDEN)
    assert bool(jnp.all(jnp.isfinite(out_bf16)))
    assert jnp.allclose(out_bf16, ref, atol=0.25, rtol=0.1), "bf16 mismatch vs reference"

    print("KERNEL_OK")
</pallas_src>

<mosaic_0001>
module attributes {stable_mosaic.version = 11 : i64} {
  func.func @_encoder_kernel(%arg0: i32, %arg1: memref<1x8x2048xf32, #tpu.memory_space<vmem>>, %arg2: memref<2048x32xf32, #tpu.memory_space<vmem>>, %arg3: memref<8x32xf32, #tpu.memory_space<vmem>>, %arg4: memref<32x96xf32, #tpu.memory_space<vmem>>, %arg5: memref<32x32xf32, #tpu.memory_space<vmem>>, %arg6: memref<1x32xf32, #tpu.memory_space<vmem>>, %arg7: memref<1x32xf32, #tpu.memory_space<vmem>>, %arg8: memref<1x32xf32, #tpu.memory_space<vmem>>, %arg9: memref<32x128xf32, #tpu.memory_space<vmem>>, %arg10: memref<1x128xf32, #tpu.memory_space<vmem>>, %arg11: memref<128x32xf32, #tpu.memory_space<vmem>>, %arg12: memref<1x32xf32, #tpu.memory_space<vmem>>, %arg13: memref<1x32xf32, #tpu.memory_space<vmem>>, %arg14: memref<1x32xf32, #tpu.memory_space<vmem>>, %arg15: memref<1x8x32xf32, #tpu.memory_space<vmem>>) attributes {dimension_semantics = [#tpu.dimension_semantics<parallel>], iteration_bounds = array<i64: 2>, scalar_prefetch = 0 : i64, scratch_operands = 0 : i64, tpu.core_type = #tpu.core_type<tc>, window_params = [{transform_indices = @transform_0, window_bounds = array<i64: 1, 8, 2048>}, {pipeline_mode = #tpu.pipeline_mode<synchronous>, transform_indices = @transform_1, window_bounds = array<i64: 2048, 32>}, {pipeline_mode = #tpu.pipeline_mode<synchronous>, transform_indices = @transform_2, window_bounds = array<i64: 8, 32>}, {pipeline_mode = #tpu.pipeline_mode<synchronous>, transform_indices = @transform_3, window_bounds = array<i64: 32, 96>}, {pipeline_mode = #tpu.pipeline_mode<synchronous>, transform_indices = @transform_4, window_bounds = array<i64: 32, 32>}, {pipeline_mode = #tpu.pipeline_mode<synchronous>, transform_indices = @transform_5, window_bounds = array<i64: 1, 32>}, {pipeline_mode = #tpu.pipeline_mode<synchronous>, transform_indices = @transform_6, window_bounds = array<i64: 1, 32>}, {pipeline_mode = #tpu.pipeline_mode<synchronous>, transform_indices = @transform_7, window_bounds = array<i64: 1, 32>}, {pipeline_mode = #tpu.pipeline_mode<synchronous>, transform_indices = @transform_8, window_bounds = array<i64: 32, 128>}, {pipeline_mode = #tpu.pipeline_mode<synchronous>, transform_indices = @transform_9, window_bounds = array<i64: 1, 128>}, {pipeline_mode = #tpu.pipeline_mode<synchronous>, transform_indices = @transform_10, window_bounds = array<i64: 128, 32>}, {pipeline_mode = #tpu.pipeline_mode<synchronous>, transform_indices = @transform_11, window_bounds = array<i64: 1, 32>}, {pipeline_mode = #tpu.pipeline_mode<synchronous>, transform_indices = @transform_12, window_bounds = array<i64: 1, 32>}, {pipeline_mode = #tpu.pipeline_mode<synchronous>, transform_indices = @transform_13, window_bounds = array<i64: 1, 32>}, {transform_indices = @transform_14, window_bounds = array<i64: 1, 8, 32>}]} {
    %c0 = arith.constant 0 : index
    %c0_0 = arith.constant 0 : index
    %c0_1 = arith.constant 0 : index
    %0 = vector.load %arg1[%c0, %c0_0, %c0_1] : memref<1x8x2048xf32, #tpu.memory_space<vmem>>, vector<1x8x2048xf32>
    %1 = vector.shape_cast %0 : vector<1x8x2048xf32> to vector<8x2048xf32>
    %c0_2 = arith.constant 0 : index
    %c0_3 = arith.constant 0 : index
    %2 = vector.load %arg2[%c0_2, %c0_3] : memref<2048x32xf32, #tpu.memory_space<vmem>>, vector<2048x32xf32>
    %cst = arith.constant dense<0.000000e+00> : vector<8x32xf32>
    %3 = tpu.matmul %1, %2, %cst {dimension_numbers = #tpu.dot_dimension_numbers<[1], [0], [0], [1], [0, 0, 1, 1], [], []>} : vector<8x2048xf32>, vector<2048x32xf32>, vector<8x32xf32> -> vector<8x32xf32>
    %c0_4 = arith.constant 0 : index
    %c0_5 = arith.constant 0 : index
    %4 = vector.load %arg3[%c0_4, %c0_5] : memref<8x32xf32, #tpu.memory_space<vmem>>, vector<8x32xf32>
    %5 = arith.addf %3, %4 : vector<8x32xf32>
    %c0_i32 = arith.constant 0 : i32
    %c2_i32 = arith.constant 2 : i32
    %6 = arith.addi %c0_i32, %c2_i32 : i32
    %c1_i32 = arith.constant 1 : i32
    %7 = scf.for %arg16 = %c0_i32 to %6 step %c1_i32 iter_args(%arg17 = %5) -> (vector<8x32xf32>)  : i32 {
      %c0_9 = arith.constant 0 : index
      %c0_10 = arith.constant 0 : index
      %11 = vector.load %arg4[%c0_9, %c0_10] : memref<32x96xf32, #tpu.memory_space<vmem>>, vector<32x96xf32>
      %cst_11 = arith.constant dense<0.000000e+00> : vector<8x96xf32>
      %12 = tpu.matmul %arg17, %11, %cst_11 {dimension_numbers = #tpu.dot_dimension_numbers<[1], [0], [0], [1], [0, 0, 1, 1], [], []>} : vector<8x32xf32>, vector<32x96xf32>, vector<8x96xf32> -> vector<8x96xf32>
      %13 = vector.extract_strided_slice %12 {offsets = [0, 0], sizes = [8, 32], strides = [1, 1]} : vector<8x96xf32> to vector<8x32xf32>
      %14 = vector.extract_strided_slice %12 {offsets = [0, 32], sizes = [8, 32], strides = [1, 1]} : vector<8x96xf32> to vector<8x32xf32>
      %15 = vector.extract_strided_slice %12 {offsets = [0, 64], sizes = [8, 32], strides = [1, 1]} : vector<8x96xf32> to vector<8x32xf32>
      %16 = vector.extract_strided_slice %13 {offsets = [0, 0], sizes = [8, 16], strides = [1, 1]} : vector<8x32xf32> to vector<8x16xf32>
      %17 = vector.extract_strided_slice %14 {offsets = [0, 0], sizes = [8, 16], strides = [1, 1]} : vector<8x32xf32> to vector<8x16xf32>
      %18 = vector.extract_strided_slice %15 {offsets = [0, 0], sizes = [8, 16], strides = [1, 1]} : vector<8x32xf32> to vector<8x16xf32>
      "tpu.trace_start"() <{level = 10 : i32, message = "qd,kd->qk"}> : () -> ()
      %cst_12 = arith.constant dense<0.000000e+00> : vector<8x8xf32>
      %19 = tpu.matmul %16, %17, %cst_12 {dimension_numbers = #tpu.dot_dimension_numbers<[1], [1], [0], [0], [0, 0, 1, 0], [], []>} : vector<8x16xf32>, vector<8x16xf32>, vector<8x8xf32> -> vector<8x8xf32>
      "tpu.trace_stop"() : () -> ()
      %cst_13 = arith.constant dense<0xFF800000> : vector<8xf32>
      %20 = vector.multi_reduction <maximumf>, %19, %cst_13 [1] : vector<8x8xf32> to vector<8xf32>
      %21 = vector.shape_cast %20 : vector<8xf32> to vector<8x1xf32>
      %22 = vector.broadcast %21 : vector<8x1xf32> to vector<8x8xf32>
      %23 = arith.subf %19, %22 : vector<8x8xf32>
      %24 = math.exp %23 : vector<8x8xf32>
      %cst_14 = arith.constant dense<0.000000e+00> : vector<8xf32>
      %25 = vector.multi_reduction <add>, %24, %cst_14 [1] : vector<8x8xf32> to vector<8xf32>
      %26 = vector.shape_cast %25 : vector<8xf32> to vector<8x1xf32>
      %27 = tpu.reciprocal %26 : vector<8x1xf32> -> vector<8x1xf32>
      %28 = vector.broadcast %27 : vector<8x1xf32> to vector<8x8xf32>
      %29 = arith.mulf %24, %28 : vector<8x8xf32>
      "tpu.trace_start"() <{level = 10 : i32, message = "qk,kd->qd"}> : () -> ()
      %cst_15 = arith.constant dense<0.000000e+00> : vector<8x16xf32>
      %30 = tpu.matmul %29, %18, %cst_15 {dimension_numbers = #tpu.dot_dimension_numbers<[1], [0], [0], [1], [0, 0, 1, 1], [], []>} : vector<8x8xf32>, vector<8x16xf32>, vector<8x16xf32> -> vector<8x16xf32>
      "tpu.trace_stop"() : () -> ()
      %31 = vector.extract_strided_slice %13 {offsets = [0, 16], sizes = [8, 16], strides = [1, 1]} : vector<8x32xf32> to vector<8x16xf32>
      %32 = vector.extract_strided_slice %14 {offsets = [0, 16], sizes = [8, 16], strides = [1, 1]} : vector<8x32xf32> to vector<8x16xf32>
      %33 = vector.extract_strided_slice %15 {offsets = [0, 16], sizes = [8, 16], strides = [1, 1]} : vector<8x32xf32> to vector<8x16xf32>
      "tpu.trace_start"() <{level = 10 : i32, message = "qd,kd->qk"}> : () -> ()
      %cst_16 = arith.constant dense<0.000000e+00> : vector<8x8xf32>
      %34 = tpu.matmul %31, %32, %cst_16 {dimension_numbers = #tpu.dot_dimension_numbers<[1], [1], [0], [0], [0, 0, 1, 0], [], []>} : vector<8x16xf32>, vector<8x16xf32>, vector<8x8xf32> -> vector<8x8xf32>
      "tpu.trace_stop"() : () -> ()
      %cst_17 = arith.constant dense<0xFF800000> : vector<8xf32>
      %35 = vector.multi_reduction <maximumf>, %34, %cst_17 [1] : vector<8x8xf32> to vector<8xf32>
      %36 = vector.shape_cast %35 : vector<8xf32> to vector<8x1xf32>
      %37 = vector.broadcast %36 : vector<8x1xf32> to vector<8x8xf32>
      %38 = arith.subf %34, %37 : vector<8x8xf32>
      %39 = math.exp %38 : vector<8x8xf32>
      %cst_18 = arith.constant dense<0.000000e+00> : vector<8xf32>
      %40 = vector.multi_reduction <add>, %39, %cst_18 [1] : vector<8x8xf32> to vector<8xf32>
      %41 = vector.shape_cast %40 : vector<8xf32> to vector<8x1xf32>
      %42 = tpu.reciprocal %41 : vector<8x1xf32> -> vector<8x1xf32>
      %43 = vector.broadcast %42 : vector<8x1xf32> to vector<8x8xf32>
      %44 = arith.mulf %39, %43 : vector<8x8xf32>
      "tpu.trace_start"() <{level = 10 : i32, message = "qk,kd->qd"}> : () -> ()
      %cst_19 = arith.constant dense<0.000000e+00> : vector<8x16xf32>
      %45 = tpu.matmul %44, %33, %cst_19 {dimension_numbers = #tpu.dot_dimension_numbers<[1], [0], [0], [1], [0, 0, 1, 1], [], []>} : vector<8x8xf32>, vector<8x16xf32>, vector<8x16xf32> -> vector<8x16xf32>
      "tpu.trace_stop"() : () -> ()
      %46 = tpu.concatenate %30, %45 in 1 : vector<8x16xf32>, vector<8x16xf32> -> vector<8x32xf32>
      %c0_20 = arith.constant 0 : index
      %c0_21 = arith.constant 0 : index
      %47 = vector.load %arg5[%c0_20, %c0_21] : memref<32x32xf32, #tpu.memory_space<vmem>>, vector<32x32xf32>
      %cst_22 = arith.constant dense<0.000000e+00> : vector<8x32xf32>
      %48 = tpu.matmul %46, %47, %cst_22 {dimension_numbers = #tpu.dot_dimension_numbers<[1], [0], [0], [1], [0, 0, 1, 1], [], []>} : vector<8x32xf32>, vector<32x32xf32>, vector<8x32xf32> -> vector<8x32xf32>
      %c0_23 = arith.constant 0 : index
      %c0_24 = arith.constant 0 : index
      %49 = vector.load %arg6[%c0_23, %c0_24] : memref<1x32xf32, #tpu.memory_space<vmem>>, vector<1x32xf32>
      %50 = vector.broadcast %49 : vector<1x32xf32> to vector<8x32xf32>
      %51 = arith.addf %48, %50 : vector<8x32xf32>
      %52 = arith.addf %51, %arg17 : vector<8x32xf32>
      %cst_25 = arith.constant dense<0.000000e+00> : vector<8xf32>
      %53 = vector.multi_reduction <add>, %52, %cst_25 [1] : vector<8x32xf32> to vector<8xf32>
      %54 = vector.shape_cast %53 : vector<8xf32> to vector<8x1xf32>
      %cst_26 = arith.constant 3.200000e+01 : f32
      %55 = vector.broadcast %cst_26 : f32 to vector<8x1xf32>
      %56 = arith.divf %54, %55 : vector<8x1xf32>
      %57 = vector.broadcast %56 : vector<8x1xf32> to vector<8x32xf32>
      %58 = arith.subf %52, %57 : vector<8x32xf32>
      %59 = arith.mulf %58, %58 : vector<8x32xf32>
      %cst_27 = arith.constant dense<0.000000e+00> : vector<8xf32>
      %60 = vector.multi_reduction <add>, %59, %cst_27 [1] : vector<8x32xf32> to vector<8xf32>
      %61 = vector.shape_cast %60 : vector<8xf32> to vector<8x1xf32>
      %cst_28 = arith.constant 3.200000e+01 : f32
      %62 = vector.broadcast %cst_28 : f32 to vector<8x1xf32>
      %63 = arith.divf %61, %62 : vector<8x1xf32>
      %64 = vector.broadcast %56 : vector<8x1xf32> to vector<8x32xf32>
      %65 = arith.subf %52, %64 : vector<8x32xf32>
      %cst_29 = arith.constant 9.99999974E-6 : f32
      %66 = vector.broadcast %cst_29 : f32 to vector<8x1xf32>
      %67 = arith.addf %63, %66 : vector<8x1xf32>
      %68 = math.rsqrt %67 : vector<8x1xf32>
      %69 = vector.broadcast %68 : vector<8x1xf32> to vector<8x32xf32>
      %70 = arith.mulf %65, %69 : vector<8x32xf32>
      %c0_30 = arith.constant 0 : index
      %c0_31 = arith.constant 0 : index
      %71 = vector.load %arg7[%c0_30, %c0_31] : memref<1x32xf32, #tpu.memory_space<vmem>>, vector<1x32xf32>
      %72 = vector.broadcast %71 : vector<1x32xf32> to vector<8x32xf32>
      %73 = arith.mulf %70, %72 : vector<8x32xf32>
      %c0_32 = arith.constant 0 : index
      %c0_33 = arith.constant 0 : index
      %74 = vector.load %arg8[%c0_32, %c0_33] : memref<1x32xf32, #tpu.memory_space<vmem>>, vector<1x32xf32>
      %75 = vector.broadcast %74 : vector<1x32xf32> to vector<8x32xf32>
      %76 = arith.addf %73, %75 : vector<8x32xf32>
      %c0_34 = arith.constant 0 : index
      %c0_35 = arith.constant 0 : index
      %77 = vector.load %arg9[%c0_34, %c0_35] : memref<32x128xf32, #tpu.memory_space<vmem>>, vector<32x128xf32>
      %cst_36 = arith.constant dense<0.000000e+00> : vector<8x128xf32>
      %78 = tpu.matmul %76, %77, %cst_36 {dimension_numbers = #tpu.dot_dimension_numbers<[1], [0], [0], [1], [0, 0, 1, 1], [], []>} : vector<8x32xf32>, vector<32x128xf32>, vector<8x128xf32> -> vector<8x128xf32>
      %c0_37 = arith.constant 0 : index
      %c0_38 = arith.constant 0 : index
      %79 = vector.load %arg10[%c0_37, %c0_38] : memref<1x128xf32, #tpu.memory_space<vmem>>, vector<1x128xf32>
      %80 = vector.broadcast %79 : vector<1x128xf32> to vector<8x128xf32>
      %81 = arith.addf %78, %80 : vector<8x128xf32>
      %cst_39 = arith.constant 0.000000e+00 : f32
      %82 = vector.broadcast %cst_39 : f32 to vector<8x128xf32>
      %83 = arith.maximumf %81, %82 : vector<8x128xf32>
      %c0_40 = arith.constant 0 : index
      %c0_41 = arith.constant 0 : index
      %84 = vector.load %arg11[%c0_40, %c0_41] : memref<128x32xf32, #tpu.memory_space<vmem>>, vector<128x32xf32>
      %cst_42 = arith.constant dense<0.000000e+00> : vector<8x32xf32>
      %85 = tpu.matmul %83, %84, %cst_42 {dimension_numbers = #tpu.dot_dimension_numbers<[1], [0], [0], [1], [0, 0, 1, 1], [], []>} : vector<8x128xf32>, vector<128x32xf32>, vector<8x32xf32> -> vector<8x32xf32>
      %c0_43 = arith.constant 0 : index
      %c0_44 = arith.constant 0 : index
      %86 = vector.load %arg12[%c0_43, %c0_44] : memref<1x32xf32, #tpu.memory_space<vmem>>, vector<1x32xf32>
      %87 = vector.broadcast %86 : vector<1x32xf32> to vector<8x32xf32>
      %88 = arith.addf %85, %87 : vector<8x32xf32>
      %89 = arith.addf %88, %76 : vector<8x32xf32>
      %cst_45 = arith.constant dense<0.000000e+00> : vector<8xf32>
      %90 = vector.multi_reduction <add>, %89, %cst_45 [1] : vector<8x32xf32> to vector<8xf32>
      %91 = vector.shape_cast %90 : vector<8xf32> to vector<8x1xf32>
      %cst_46 = arith.constant 3.200000e+01 : f32
      %92 = vector.broadcast %cst_46 : f32 to vector<8x1xf32>
      %93 = arith.divf %91, %92 : vector<8x1xf32>
      %94 = vector.broadcast %93 : vector<8x1xf32> to vector<8x32xf32>
      %95 = arith.subf %89, %94 : vector<8x32xf32>
      %96 = arith.mulf %95, %95 : vector<8x32xf32>
      %cst_47 = arith.constant dense<0.000000e+00> : vector<8xf32>
      %97 = vector.multi_reduction <add>, %96, %cst_47 [1] : vector<8x32xf32> to vector<8xf32>
      %98 = vector.shape_cast %97 : vector<8xf32> to vector<8x1xf32>
      %cst_48 = arith.constant 3.200000e+01 : f32
      %99 = vector.broadcast %cst_48 : f32 to vector<8x1xf32>
      %100 = arith.divf %98, %99 : vector<8x1xf32>
      %101 = vector.broadcast %93 : vector<8x1xf32> to vector<8x32xf32>
      %102 = arith.subf %89, %101 : vector<8x32xf32>
      %cst_49 = arith.constant 9.99999974E-6 : f32
      %103 = vector.broadcast %cst_49 : f32 to vector<8x1xf32>
      %104 = arith.addf %100, %103 : vector<8x1xf32>
      %105 = math.rsqrt %104 : vector<8x1xf32>
      %106 = vector.broadcast %105 : vector<8x1xf32> to vector<8x32xf32>
      %107 = arith.mulf %102, %106 : vector<8x32xf32>
      %c0_50 = arith.constant 0 : index
      %c0_51 = arith.constant 0 : index
      %108 = vector.load %arg13[%c0_50, %c0_51] : memref<1x32xf32, #tpu.memory_space<vmem>>, vector<1x32xf32>
      %109 = vector.broadcast %108 : vector<1x32xf32> to vector<8x32xf32>
      %110 = arith.mulf %107, %109 : vector<8x32xf32>
      %c0_52 = arith.constant 0 : index
      %c0_53 = arith.constant 0 : index
      %111 = vector.load %arg14[%c0_52, %c0_53] : memref<1x32xf32, #tpu.memory_space<vmem>>, vector<1x32xf32>
      %112 = vector.broadcast %111 : vector<1x32xf32> to vector<8x32xf32>
      %113 = arith.addf %110, %112 : vector<8x32xf32>
      scf.yield %113 : vector<8x32xf32>
    }
    %c0_6 = arith.constant 0 : index
    %c0_7 = arith.constant 0 : index
    %c0_8 = arith.constant 0 : index
    %8 = vector.load %arg15[%c0_6, %c0_7, %c0_8] : memref<1x8x32xf32, #tpu.memory_space<vmem>>, vector<1x8x32xf32>
    %9 = vector.shape_cast %8 : vector<1x8x32xf32> to vector<8x32xf32>
    %10 = vector.shape_cast %7 : vector<8x32xf32> to vector<1x8x32xf32>
    tpu.vector_store %arg15[%c0_6, %c0_7, %c0_8], %10 {strides = array<i32>} : memref<1x8x32xf32, #tpu.memory_space<vmem>>, vector<1x8x32xf32>,
    return
  }
  func.func @transform_0(%arg0: i32) -> (i32, i32, i32) {
    %c0_i32 = arith.constant 0 : i32
    %c0_i32_0 = arith.constant 0 : i32
    %c0_i32_1 = arith.constant 0 : i32
    return %arg0, %c0_i32, %c0_i32_0 : i32, i32, i32
  }
  func.func @transform_1(%arg0: i32) -> (i32, i32) {
    %c0_i32 = arith.constant 0 : i32
    %c0_i32_0 = arith.constant 0 : i32
    %c0_i32_1 = arith.constant 0 : i32
    return %c0_i32, %c0_i32_0 : i32, i32
  }
  func.func @transform_2(%arg0: i32) -> (i32, i32) {
    %c0_i32 = arith.constant 0 : i32
    %c0_i32_0 = arith.constant 0 : i32
    %c0_i32_1 = arith.constant 0 : i32
    return %c0_i32, %c0_i32_0 : i32, i32
  }
  func.func @transform_3(%arg0: i32) -> (i32, i32) {
    %c0_i32 = arith.constant 0 : i32
    %c0_i32_0 = arith.constant 0 : i32
    %c0_i32_1 = arith.constant 0 : i32
    return %c0_i32, %c0_i32_0 : i32, i32
  }
  func.func @transform_4(%arg0: i32) -> (i32, i32) {
    %c0_i32 = arith.constant 0 : i32
    %c0_i32_0 = arith.constant 0 : i32
    %c0_i32_1 = arith.constant 0 : i32
    return %c0_i32, %c0_i32_0 : i32, i32
  }
  func.func @transform_5(%arg0: i32) -> (i32, i32) {
    %c0_i32 = arith.constant 0 : i32
    %c0_i32_0 = arith.constant 0 : i32
    %c0_i32_1 = arith.constant 0 : i32
    return %c0_i32, %c0_i32_0 : i32, i32
  }
  func.func @transform_6(%arg0: i32) -> (i32, i32) {
    %c0_i32 = arith.constant 0 : i32
    %c0_i32_0 = arith.constant 0 : i32
    %c0_i32_1 = arith.constant 0 : i32
    return %c0_i32, %c0_i32_0 : i32, i32
  }
  func.func @transform_7(%arg0: i32) -> (i32, i32) {
    %c0_i32 = arith.constant 0 : i32
    %c0_i32_0 = arith.constant 0 : i32
    %c0_i32_1 = arith.constant 0 : i32
    return %c0_i32, %c0_i32_0 : i32, i32
  }
  func.func @transform_8(%arg0: i32) -> (i32, i32) {
    %c0_i32 = arith.constant 0 : i32
    %c0_i32_0 = arith.constant 0 : i32
    %c0_i32_1 = arith.constant 0 : i32
    return %c0_i32, %c0_i32_0 : i32, i32
  }
  func.func @transform_9(%arg0: i32) -> (i32, i32) {
    %c0_i32 = arith.constant 0 : i32
    %c0_i32_0 = arith.constant 0 : i32
    %c0_i32_1 = arith.constant 0 : i32
    return %c0_i32, %c0_i32_0 : i32, i32
  }
  func.func @transform_10(%arg0: i32) -> (i32, i32) {
    %c0_i32 = arith.constant 0 : i32
    %c0_i32_0 = arith.constant 0 : i32
    %c0_i32_1 = arith.constant 0 : i32
    return %c0_i32, %c0_i32_0 : i32, i32
  }
  func.func @transform_11(%arg0: i32) -> (i32, i32) {
    %c0_i32 = arith.constant 0 : i32
    %c0_i32_0 = arith.constant 0 : i32
    %c0_i32_1 = arith.constant 0 : i32
    return %c0_i32, %c0_i32_0 : i32, i32
  }
  func.func @transform_12(%arg0: i32) -> (i32, i32) {
    %c0_i32 = arith.constant 0 : i32
    %c0_i32_0 = arith.constant 0 : i32
    %c0_i32_1 = arith.constant 0 : i32
    return %c0_i32, %c0_i32_0 : i32, i32
  }
  func.func @transform_13(%arg0: i32) -> (i32, i32) {
    %c0_i32 = arith.constant 0 : i32
    %c0_i32_0 = arith.constant 0 : i32
    %c0_i32_1 = arith.constant 0 : i32
    return %c0_i32, %c0_i32_0 : i32, i32
  }
  func.func @transform_14(%arg0: i32) -> (i32, i32, i32) {
    %c0_i32 = arith.constant 0 : i32
    %c0_i32_0 = arith.constant 0 : i32
    %c0_i32_1 = arith.constant 0 : i32
    return %arg0, %c0_i32, %c0_i32_0 : i32, i32, i32
  }
}

</mosaic_0001>

<bundles_post_ra>
// kernel: tpu_custom_call.1
= control target key start
LH: loop header
LB: loop body
LE: loop exit
PB: predicated region body
PF: predicated region fallthrough
CT: control target
= control target key end

     0   :  { %19 = vsyncpa [#allocation3], 0  ;;  %s3880_s0 = inlined_call_operand.vmem [shape: f32[2,8,2048], index: 0, kind: input, shape index: {}]   ;;  %s3881_s1 = inlined_call_operand.vmem [shape: f32[2048,32], index: 1, kind: input, shape index: {}]   ;;  %s3882_s2 = inlined_call_operand.vmem [shape: f32[8,32], index: 2, kind: input, shape index: {}]   ;;  %s3883_s3 = inlined_call_operand.vmem [shape: f32[32,96], index: 3, kind: input, shape index: {}]   ;;  %s3884_s4 = inlined_call_operand.vmem [shape: f32[32,32], index: 4, kind: input, shape index: {}]   ;;  %s3885_s5 = inlined_call_operand.vmem [shape: f32[1,32], index: 5, kind: input, shape index: {}]   ;;  %s3886_s6 = inlined_call_operand.vmem [shape: f32[1,32], index: 6, kind: input, shape index: {}]   ;;  %s3887_s7 = inlined_call_operand.vmem [shape: f32[1,32], index: 7, kind: input, shape index: {}]   ;;  %s3888_s8 = inlined_call_operand.vmem [shape: f32[32,128], index: 8, kind: input, shape index: {}]   ;;  %s3889_s9 = inlined_call_operand.vmem [shape: f32[1,128], index: 9, kind: input, shape index: {}]   ;;  %s3890_s10 = inlined_call_operand.vmem [shape: f32[128,32], index: 10, kind: input, shape index: {}]   ;;  %s3891_s11 = inlined_call_operand.vmem [shape: f32[1,32], index: 11, kind: input, shape index: {}]   ;;  %s3892_s12 = inlined_call_operand.vmem [shape: f32[1,32], index: 12, kind: input, shape index: {}]   ;;  %s3893_s13 = inlined_call_operand.vmem [shape: f32[1,32], index: 13, kind: input, shape index: {}]   ;;  %s3894_s14 = inlined_call_operand.hbm [shape: f32[2,8,32], index: 14, kind: output, shape index: {}]  }
   0x1   :  { %21 = vsyncpa [#allocation3 + $0x1], 0  ;;  %s2799_s29 = smov 0   ;;  %s2801_s30 = smov 0  }
   0x2   :  { %s2803_s15 = smov 0   ;;  %s2805_s16 = smov 0  }
   0x3 LB: > { %3902 = sst [smem:[#allocation5_spill]] %s2693_s29  ;;  %s2820_s17 = sadd.s32 4294967295, %s2705_s16   ;;  %s2705_s16 = sphi %s2805_s16, %s3915_s16   ;;  %s2701_s15 = sphi %s2803_s15, %s3917_s15   ;;  %s2697_s30 = sphi %s2801_s30, %s3919_s30   ;;  %s2693_s29 = sphi %s2799_s29, %s3918_s29  }
   0x4   : > { %3903 = sst [smem:[#allocation6_spill]] %s2701_s15  ;;  %s2126_s18 = sadd.s32 4294967294, %s2705_s16  }
   0x5   : > { %3904 = sst [smem:[#allocation7_spill]] %s2705_s16  ;;  %s2824_s19 = sadd.s32 1, %s2705_s16  }
   0x6   : > { %3905 = sst [smem:[#allocation8_spill]] %s2824_s19  ;;  %s333_s20 = sadd.s32 1, %s2701_s15 }
   0x7   : > { %s330_s21 = ssub.s32 %s2705_s16, %s2824_s19  ;;  %p343_p0 = scmp.ne.s32.totalorder %s2701_s15, %s2697_s30 }
   0x8   : > { %p331_p1 = scmp.eq.s32.totalorder %s330_s21, 0  ;;  %p344_p2 = scmp.eq.s32.totalorder %s2820_s17, 1 }
   0x9   : > { %p349_p3 = scmp.ne.s32.totalorder %s2697_s30, %s2693_s29  ;;  %p350_p4 = scmp.eq.s32.totalorder %s2126_s18, 1 }
   0xa   : > { %s2835_s22 = scalar_select %p331_p1, %s2701_s15, %s333_s20  }
   0xb   : > { %p2837_p5 = por %p344_p2, %p343_p0  ;;  %p2841_p6 = por %p350_p4, %p349_p3 }
   0xc   : > { %3906 = sst [smem:[#allocation9_spill]] %s2835_s22  ;;  %p2129_p7 = scmp.ge.s32.totalorder %s2705_s16, 1 }
   0xd   : > { %s3908_s24 = scalar_select %p2841_p6, 1, 0 }
   0xe   : > { %p415_p8 = scmp.lt.s32.totalorder %s2705_s16, 3 }
   0xf   : > { %3909 = sst [smem:[#allocation10_spill]] %s3908_s24 }
  0x10   : > { %p416_p9 = pnand %p2129_p7, %p415_p8 }
  0x11   : > { %s3899_s25 = sand.u32 (!%p416_p9), 1, %s2697_s30   ;;  %p461_p10 = scmp.lt.s32.totalorder (!%p416_p9), %s2820_s17, 1 }
  0x12   : > { %419 = sbr.rel (%p416_p9) target bundleno = 2718 (0xa9e), region = 76  ;;  %s2859_s22 = sshll.u32 (!%p416_p9), %s3899_s25, 3 }
  0x13   : > { %s3654_s18 = smov (!%p416_p9), 0  }
  0x17   : > { %v513_v0 = vld [vmem:[%s3881_s1 + $0xf8] sm:$0xff]  ;;  %v512_v4 = vld [vmem:[%s3881_s1 + $0xf0] sm:$0xff]  ;;  %v511_v8 = vld [vmem:[%s3881_s1 + $0xe8] sm:$0xff]  ;;  %s2988_s24 = scalar_select %p461_p10, %s2820_s17, 1 }
  0x18   : > { %v545_v1 = vld [vmem:[%s3881_s1 + $0x1f8] sm:$0xff]  ;;  %2154 = vmatprep.subr.mxu0 %v513_v0  ;;  %v544_v5 = vld [vmem:[%s3881_s1 + $0x1f0] sm:$0xff]  ;;  %v543_v9 = vld [vmem:[%s3881_s1 + $0x1e8] sm:$0xff] }
  0x19   : > { %v497_v2 = vld [vmem:[%s3881_s1 + $0x78] sm:$0xff]  ;;  %2189 = vmatprep.subr.mxu1 %v545_v1  ;;  %v496_v6 = vld [vmem:[%s3881_s1 + $0x70] sm:$0xff]  ;;  %v495_v10 = vld [vmem:[%s3881_s1 + $0x68] sm:$0xff]  ;;  %s2153_s21 = sshll.u32 %s2988_s24, 7 }
  0x1a   : > { %v529_v3 = vld [vmem:[%s3881_s1 + $0x178] sm:$0xff]  ;;  %2155 = vmatpush3.msra.mxu0 %v497_v2  ;;  %v528_v7 = vld [vmem:[%s3881_s1 + $0x170] sm:$0xff]  ;;  %v527_v11 = vld [vmem:[%s3881_s1 + $0x168] sm:$0xff]  ;;  %s3036_s16 = scalar_lea.vmem %s3880_s0, %s2153_s21 }
  0x1b   : > { %2190 = vmatpush3.msra.mxu1 %v529_v3  ;;  %2156 = vmatprep.subr.mxu0 %v512_v4  ;;  %v510_v12 = vld [vmem:[%s3881_s1 + $0xe0] sm:$0xff]  ;;  %v509_v16 = vld [vmem:[%s3881_s1 + $0xd8] sm:$0xff]  ;;  %v508_v20 = vld [vmem:[%s3881_s1 + $0xd0] sm:$0xff] }
  0x1c   : > { %2191 = vmatprep.subr.mxu1 %v544_v5  ;;  %2157 = vmatpush3.msra.mxu0 %v496_v6  ;;  %v542_v13 = vld [vmem:[%s3881_s1 + $0x1e0] sm:$0xff]  ;;  %v541_v17 = vld [vmem:[%s3881_s1 + $0x1d8] sm:$0xff]  ;;  %v540_v21 = vld [vmem:[%s3881_s1 + $0x1d0] sm:$0xff] }
  0x1d   : > { %2192 = vmatpush3.msra.mxu1 %v528_v7  ;;  %2158 = vmatprep.subr.mxu0 %v511_v8  ;;  %v494_v14 = vld [vmem:[%s3881_s1 + $0x60] sm:$0xff]  ;;  %v493_v18 = vld [vmem:[%s3881_s1 + $0x58] sm:$0xff]  ;;  %v492_v22 = vld [vmem:[%s3881_s1 + $0x50] sm:$0xff] }
  0x1e   : > { %2193 = vmatprep.subr.mxu1 %v543_v9  ;;  %v526_v15 = vld [vmem:[%s3881_s1 + $0x160] sm:$0xff]  ;;  %2159 = vmatpush3.msra.mxu0 %v495_v10  ;;  %v525_v19 = vld [vmem:[%s3881_s1 + $0x158] sm:$0xff]  ;;  %v524_v23 = vld [vmem:[%s3881_s1 + $0x150] sm:$0xff] }
  0x1f   : > { %2194 = vmatpush3.msra.mxu1 %v527_v11  ;;  %2160 = vmatprep.subr.mxu0 %v510_v12  ;;  %v507_v24 = vld [vmem:[%s3881_s1 + $0xc8] sm:$0xff]  ;;  %v506_v28 = vld [vmem:[%s3881_s1 + $0xc0] sm:$0xff]  ;;  %v505_v32 = vld [vmem:[%s3881_s1 + $0xb8] sm:$0xff] }
  0x20   : > { %2195 = vmatprep.subr.mxu1 %v542_v13  ;;  %2161 = vmatpush3.msra.mxu0 %v494_v14  ;;  %v539_v25 = vld [vmem:[%s3881_s1 + $0x1c8] sm:$0xff]  ;;  %v538_v29 = vld [vmem:[%s3881_s1 + $0x1c0] sm:$0xff]  ;;  %v537_v33 = vld [vmem:[%s3881_s1 + $0x1b8] sm:$0xff] }
  0x21   : > { %2196 = vmatpush3.msra.mxu1 %v526_v15  ;;  %2162 = vmatprep.subr.mxu0 %v509_v16  ;;  %v491_v26 = vld [vmem:[%s3881_s1 + $0x48] sm:$0xff]  ;;  %v490_v30 = vld [vmem:[%s3881_s1 + $0x40] sm:$0xff]  ;;  %v489_v34 = vld [vmem:[%s3881_s1 + $0x38] sm:$0xff] }
  0x22   : > { %2197 = vmatprep.subr.mxu1 %v541_v17  ;;  %2163 = vmatpush3.msra.mxu0 %v493_v18  ;;  %v523_v27 = vld [vmem:[%s3881_s1 + $0x148] sm:$0xff]  ;;  %v522_v31 = vld [vmem:[%s3881_s1 + $0x140] sm:$0xff]  ;;  %v521_v35 = vld [vmem:[%s3881_s1 + $0x138] sm:$0xff] }
  0x23   : > { %2198 = vmatpush3.msra.mxu1 %v525_v19  ;;  %2164 = vmatprep.subr.mxu0 %v508_v20  ;;  %v504_v36 = vld [vmem:[%s3881_s1 + $0xb0] sm:$0xff]  ;;  %v503_v40 = vld [vmem:[%s3881_s1 + $0xa8] sm:$0xff]  ;;  %v502_v44 = vld [vmem:[%s3881_s1 + $0xa0] sm:$0xff] }
  0x24   : > { %2199 = vmatprep.subr.mxu1 %v540_v21  ;;  %2165 = vmatpush3.msra.mxu0 %v492_v22  ;;  %v536_v37 = vld [vmem:[%s3881_s1 + $0x1b0] sm:$0xff]  ;;  %v535_v41 = vld [vmem:[%s3881_s1 + $0x1a8] sm:$0xff]  ;;  %v534_v45 = vld [vmem:[%s3881_s1 + $0x1a0] sm:$0xff] }
  0x25   : > { %2200 = vmatpush3.msra.mxu1 %v524_v23  ;;  %2166 = vmatprep.subr.mxu0 %v507_v24  ;;  %v488_v38 = vld [vmem:[%s3881_s1 + $0x30] sm:$0xff]  ;;  %v487_v42 = vld [vmem:[%s3881_s1 + $0x28] sm:$0xff]  ;;  %v486_v46 = vld [vmem:[%s3881_s1 + $0x20] sm:$0xff] }
  0x26   : > { %2201 = vmatprep.subr.mxu1 %v539_v25  ;;  %2167 = vmatpush3.msra.mxu0 %v491_v26  ;;  %v520_v39 = vld [vmem:[%s3881_s1 + $0x130] sm:$0xff]  ;;  %v519_v43 = vld [vmem:[%s3881_s1 + $0x128] sm:$0xff]  ;;  %v518_v47 = vld [vmem:[%s3881_s1 + $0x120] sm:$0xff] }
  0x27   : > { %2202 = vmatpush3.msra.mxu1 %v523_v27  ;;  %2168 = vmatprep.subr.mxu0 %v506_v28  ;;  %v501_v48 = vld [vmem:[%s3881_s1 + $0x98] sm:$0xff]  ;;  %v500_v52 = vld [vmem:[%s3881_s1 + $0x90] sm:$0xff]  ;;  %v499_v56 = vld [vmem:[%s3881_s1 + $0x88] sm:$0xff] }
  0x28   : > { %2203 = vmatprep.subr.mxu1 %v538_v29  ;;  %2169 = vmatpush3.msra.mxu0 %v490_v30  ;;  %v533_v49 = vld [vmem:[%s3881_s1 + $0x198] sm:$0xff]  ;;  %v532_v53 = vld [vmem:[%s3881_s1 + $0x190] sm:$0xff]  ;;  %v531_v57 = vld [vmem:[%s3881_s1 + $0x188] sm:$0xff] }
  0x29   : > { %2204 = vmatpush3.msra.mxu1 %v522_v31  ;;  %2170 = vmatprep.subr.mxu0 %v505_v32  ;;  %v485_v50 = vld [vmem:[%s3881_s1 + $0x18] sm:$0xff]  ;;  %v484_v54 = vld [vmem:[%s3881_s1 + $0x10] sm:$0xff]  ;;  %v483_v58 = vld [vmem:[%s3881_s1 + $0x8] sm:$0xff] }
  0x2a   : > { %2205 = vmatprep.subr.mxu1 %v537_v33  ;;  %2171 = vmatpush3.msra.mxu0 %v489_v34  ;;  %v517_v51 = vld [vmem:[%s3881_s1 + $0x118] sm:$0xff]  ;;  %v516_v55 = vld [vmem:[%s3881_s1 + $0x110] sm:$0xff]  ;;  %v515_v59 = vld [vmem:[%s3881_s1 + $0x108] sm:$0xff] }
  0x2b   : > { %2206 = vmatpush3.msra.mxu1 %v521_v35  ;;  %2172 = vmatprep.subr.mxu0 %v504_v36  ;;  %v498_v60 = vld [vmem:[%s3881_s1 + $0x80] sm:$0xff]  ;;  %v467_v63 = vld [vmem:[%s3036_s16 + $0x8] sm:$0xff]  ;;  %v469_v2 = vld [vmem:[%s3036_s16 + $0x18] sm:$0xff] }
  0x2c   : > { %2207 = vmatprep.subr.mxu1 %v536_v37  ;;  %2173 = vmatpush3.msra.mxu0 %v488_v38  ;;  %v530_v61 = vld [vmem:[%s3881_s1 + $0x180] sm:$0xff]  ;;  %v577_v3 = vld [vmem:[%s3881_s1 + $0x2f8] sm:$0xff]  ;;  %v468_v5 = vld [vmem:[%s3036_s16 + $0x10] sm:$0xff] }
  0x2d   : > { %2208 = vmatpush3.msra.mxu1 %v520_v39  ;;  %2174 = vmatprep.subr.mxu0 %v503_v40  ;;  %v482_v62 = vld [vmem:[%s3881_s1] sm:$0xff]  ;;  %v609_v4 = vld [vmem:[%s3881_s1 + $0x3f8] sm:$0xff]  ;;  %v576_v8 = vld [vmem:[%s3881_s1 + $0x2f0] sm:$0xff] }
  0x2e   : > { %2209 = vmatprep.subr.mxu1 %v535_v41  ;;  %2175 = vmatpush3.msra.mxu0 %v487_v42  ;;  %v514_v0 = vld [vmem:[%s3881_s1 + $0x100] sm:$0xff]  ;;  %v561_v6 = vld [vmem:[%s3881_s1 + $0x278] sm:$0xff]  ;;  %v608_v9 = vld [vmem:[%s3881_s1 + $0x3f0] sm:$0xff] }
  0x2f   : > { %2210 = vmatpush3.msra.mxu1 %v519_v43  ;;  %2176 = vmatprep.subr.mxu0 %v502_v44  ;;  %v466_v1 = vld [vmem:[%s3036_s16] sm:$0xff]  ;;  %v593_v7 = vld [vmem:[%s3881_s1 + $0x378] sm:$0xff]  ;;  %v560_v10 = vld [vmem:[%s3881_s1 + $0x270] sm:$0xff] }
  0x30   : > { %2211 = vmatprep.subr.mxu1 %v534_v45  ;;  %2177 = vmatpush3.msra.mxu0 %v486_v46  ;;  %v592_v11 = vld [vmem:[%s3881_s1 + $0x370] sm:$0xff]  ;;  %v575_v12 = vld [vmem:[%s3881_s1 + $0x2e8] sm:$0xff]  ;;  %v574_v16 = vld [vmem:[%s3881_s1 + $0x2e0] sm:$0xff] }
  0x31   : > { %2212 = vmatpush3.msra.mxu1 %v518_v47  ;;  %2178 = vmatprep.subr.mxu0 %v501_v48  ;;  %v607_v13 = vld [vmem:[%s3881_s1 + $0x3e8] sm:$0xff]  ;;  %v606_v17 = vld [vmem:[%s3881_s1 + $0x3e0] sm:$0xff]  ;;  %v573_v20 = vld [vmem:[%s3881_s1 + $0x2d8] sm:$0xff] }
  0x32   : > { %2213 = vmatprep.subr.mxu1 %v533_v49  ;;  %2179 = vmatpush3.msra.mxu0 %v485_v50  ;;  %v559_v14 = vld [vmem:[%s3881_s1 + $0x268] sm:$0xff]  ;;  %v558_v18 = vld [vmem:[%s3881_s1 + $0x260] sm:$0xff]  ;;  %v605_v21 = vld [vmem:[%s3881_s1 + $0x3d8] sm:$0xff] }
  0x33   : > { %2214 = vmatpush3.msra.mxu1 %v517_v51  ;;  %2180 = vmatprep.subr.mxu0 %v500_v52  ;;  %v591_v15 = vld [vmem:[%s3881_s1 + $0x368] sm:$0xff]  ;;  %v590_v19 = vld [vmem:[%s3881_s1 + $0x360] sm:$0xff]  ;;  %v557_v22 = vld [vmem:[%s3881_s1 + $0x258] sm:$0xff] }
  0x34   : > { %2215 = vmatprep.subr.mxu1 %v532_v53  ;;  %2181 = vmatpush3.msra.mxu0 %v484_v54  ;;  %v589_v23 = vld [vmem:[%s3881_s1 + $0x358] sm:$0xff]  ;;  %v572_v24 = vld [vmem:[%s3881_s1 + $0x2d0] sm:$0xff]  ;;  %v571_v28 = vld [vmem:[%s3881_s1 + $0x2c8] sm:$0xff] }
  0x35   : > { %2216 = vmatpush3.msra.mxu1 %v516_v55  ;;  %2182 = vmatprep.subr.mxu0 %v499_v56  ;;  %v604_v25 = vld [vmem:[%s3881_s1 + $0x3d0] sm:$0xff]  ;;  %v603_v29 = vld [vmem:[%s3881_s1 + $0x3c8] sm:$0xff]  ;;  %v570_v32 = vld [vmem:[%s3881_s1 + $0x2c0] sm:$0xff] }
  0x36   : > { %2217 = vmatprep.subr.mxu1 %v531_v57  ;;  %2183 = vmatpush3.msra.mxu0 %v483_v58  ;;  %v556_v26 = vld [vmem:[%s3881_s1 + $0x250] sm:$0xff]  ;;  %v555_v30 = vld [vmem:[%s3881_s1 + $0x248] sm:$0xff]  ;;  %v602_v33 = vld [vmem:[%s3881_s1 + $0x3c0] sm:$0xff] }
  0x37   : > { %2218 = vmatpush3.msra.mxu1 %v515_v59  ;;  %2184 = vmatprep.subr.mxu0 %v498_v60  ;;  %v588_v27 = vld [vmem:[%s3881_s1 + $0x350] sm:$0xff]  ;;  %v587_v31 = vld [vmem:[%s3881_s1 + $0x348] sm:$0xff]  ;;  %v554_v34 = vld [vmem:[%s3881_s1 + $0x240] sm:$0xff] }
  0x38   : > { %2219 = vmatprep.subr.mxu1 %v530_v61  ;;  %2185 = vmatpush3.msra.mxu0 %v482_v62  ;;  %v586_v35 = vld [vmem:[%s3881_s1 + $0x340] sm:$0xff]  ;;  %v569_v36 = vld [vmem:[%s3881_s1 + $0x2b8] sm:$0xff]  ;;  %v568_v40 = vld [vmem:[%s3881_s1 + $0x2b0] sm:$0xff] }
  0x39   : > { %803 = vmatprep.mubr.f32.mxu0 %v467_v63  ;;  %2220 = vmatpush3.msra.mxu1 %v514_v0  ;;  %v601_v37 = vld [vmem:[%s3881_s1 + $0x3b8] sm:$0xff]  ;;  %v600_v41 = vld [vmem:[%s3881_s1 + $0x3b0] sm:$0xff]  ;;  %v567_v44 = vld [vmem:[%s3881_s1 + $0x2a8] sm:$0xff] }
  0x3a   : > { %804 = vmatmul.mubr.f32.vlgmr.msra.gmra.mxu0 %v466_v1  ;;  %873 = vmatprep.mubr.f32.mxu1 %v469_v2  ;;  %v553_v38 = vld [vmem:[%s3881_s1 + $0x238] sm:$0xff]  ;;  %v552_v42 = vld [vmem:[%s3881_s1 + $0x230] sm:$0xff]  ;;  %v599_v45 = vld [vmem:[%s3881_s1 + $0x3a8] sm:$0xff] }
  0x3b   : > { %2224 = vmatprep.subr.mxu0 %v577_v3  ;;  %2259 = vmatprep.subr.mxu1 %v609_v4  ;;  %v585_v39 = vld [vmem:[%s3881_s1 + $0x338] sm:$0xff]  ;;  %v584_v43 = vld [vmem:[%s3881_s1 + $0x330] sm:$0xff]  ;;  %v551_v46 = vld [vmem:[%s3881_s1 + $0x228] sm:$0xff] }
  0x3c   : > { %874 = vmatmul.mubr.f32.vlgmr.msra.gmra.mxu1 %v468_v5  ;;  %2225 = vmatpush3.msra.mxu0 %v561_v6  ;;  %v583_v47 = vld [vmem:[%s3881_s1 + $0x328] sm:$0xff]  ;;  %v566_v48 = vld [vmem:[%s3881_s1 + $0x2a0] sm:$0xff]  ;;  %v565_v52 = vld [vmem:[%s3881_s1 + $0x298] sm:$0xff] }
  0x3d   : > { %2260 = vmatpush3.msra.mxu1 %v593_v7  ;;  %2226 = vmatprep.subr.mxu0 %v576_v8  ;;  %v598_v49 = vld [vmem:[%s3881_s1 + $0x3a0] sm:$0xff]  ;;  %v597_v53 = vld [vmem:[%s3881_s1 + $0x398] sm:$0xff]  ;;  %v564_v56 = vld [vmem:[%s3881_s1 + $0x290] sm:$0xff] }
  0x3e   : > { %2261 = vmatprep.subr.mxu1 %v608_v9  ;;  %2227 = vmatpush3.msra.mxu0 %v560_v10  ;;  %v550_v50 = vld [vmem:[%s3881_s1 + $0x220] sm:$0xff]  ;;  %v549_v54 = vld [vmem:[%s3881_s1 + $0x218] sm:$0xff]  ;;  %v596_v57 = vld [vmem:[%s3881_s1 + $0x390] sm:$0xff] }
  0x3f   : > { %2262 = vmatpush3.msra.mxu1 %v592_v11  ;;  %2228 = vmatprep.subr.mxu0 %v575_v12  ;;  %v582_v51 = vld [vmem:[%s3881_s1 + $0x320] sm:$0xff]  ;;  %v581_v55 = vld [vmem:[%s3881_s1 + $0x318] sm:$0xff]  ;;  %v548_v58 = vld [vmem:[%s3881_s1 + $0x210] sm:$0xff] }
  0x40   : > { %2263 = vmatprep.subr.mxu1 %v607_v13  ;;  %2229 = vmatpush3.msra.mxu0 %v559_v14  ;;  %v580_v59 = vld [vmem:[%s3881_s1 + $0x310] sm:$0xff]  ;;  %v563_v60 = vld [vmem:[%s3881_s1 + $0x288] sm:$0xff]  ;;  %v562_v0 = vld [vmem:[%s3881_s1 + $0x280] sm:$0xff] }
  0x41   : > { %2264 = vmatpush3.msra.mxu1 %v591_v15  ;;  %2230 = vmatprep.subr.mxu0 %v574_v16  ;;  %v595_v61 = vld [vmem:[%s3881_s1 + $0x388] sm:$0xff]  ;;  %v594_v1 = vld [vmem:[%s3881_s1 + $0x380] sm:$0xff]  ;;  %v473_v6 = vld [vmem:[%s3036_s16 + $0x38] sm:$0xff] }
  0x42   : > { %2265 = vmatprep.subr.mxu1 %v606_v17  ;;  %2231 = vmatpush3.msra.mxu0 %v558_v18  ;;  %v547_v62 = vld [vmem:[%s3881_s1 + $0x208] sm:$0xff]  ;;  %v546_v2 = vld [vmem:[%s3881_s1 + $0x200] sm:$0xff]  ;;  %v641_v7 = vld [vmem:[%s3881_s1 + $0x4f8] sm:$0xff] }
  0x43   : > { %2266 = vmatpush3.msra.mxu1 %v590_v19  ;;  %2232 = vmatprep.subr.mxu0 %v573_v20  ;;  %v579_v63 = vld [vmem:[%s3881_s1 + $0x308] sm:$0xff]  ;;  %v578_v4 = vld [vmem:[%s3881_s1 + $0x300] sm:$0xff]  ;;  %v673_v8 = vld [vmem:[%s3881_s1 + $0x5f8] sm:$0xff] }
  0x44   : > { %2267 = vmatprep.subr.mxu1 %v605_v21  ;;  %2233 = vmatpush3.msra.mxu0 %v557_v22  ;;  %v471_v3 = vld [vmem:[%s3036_s16 + $0x28] sm:$0xff]  ;;  %v470_v5 = vld [vmem:[%s3036_s16 + $0x20] sm:$0xff]  ;;  %v472_v9 = vld [vmem:[%s3036_s16 + $0x30] sm:$0xff] }
  0x45   : > { %2268 = vmatpush3.msra.mxu1 %v589_v23  ;;  %2234 = vmatprep.subr.mxu0 %v572_v24  ;;  %v625_v10 = vld [vmem:[%s3881_s1 + $0x478] sm:$0xff]  ;;  %v640_v12 = vld [vmem:[%s3881_s1 + $0x4f0] sm:$0xff]  ;;  %v639_v16 = vld [vmem:[%s3881_s1 + $0x4e8] sm:$0xff] }
  0x46   : > { %2269 = vmatprep.subr.mxu1 %v604_v25  ;;  %2235 = vmatpush3.msra.mxu0 %v556_v26  ;;  %v657_v11 = vld [vmem:[%s3881_s1 + $0x578] sm:$0xff]  ;;  %v672_v13 = vld [vmem:[%s3881_s1 + $0x5f0] sm:$0xff]  ;;  %v671_v17 = vld [vmem:[%s3881_s1 + $0x5e8] sm:$0xff] }
  0x47   : > { %2270 = vmatpush3.msra.mxu1 %v588_v27  ;;  %2236 = vmatprep.subr.mxu0 %v571_v28  ;;  %v624_v14 = vld [vmem:[%s3881_s1 + $0x470] sm:$0xff]  ;;  %v623_v18 = vld [vmem:[%s3881_s1 + $0x468] sm:$0xff]  ;;  %v638_v20 = vld [vmem:[%s3881_s1 + $0x4e0] sm:$0xff] }
  0x48   : > { %2271 = vmatprep.subr.mxu1 %v603_v29  ;;  %2237 = vmatpush3.msra.mxu0 %v555_v30  ;;  %v656_v15 = vld [vmem:[%s3881_s1 + $0x570] sm:$0xff]  ;;  %v655_v19 = vld [vmem:[%s3881_s1 + $0x568] sm:$0xff]  ;;  %v670_v21 = vld [vmem:[%s3881_s1 + $0x5e0] sm:$0xff] }
  0x49   : > { %2272 = vmatpush3.msra.mxu1 %v587_v31  ;;  %2238 = vmatprep.subr.mxu0 %v570_v32  ;;  %v622_v22 = vld [vmem:[%s3881_s1 + $0x460] sm:$0xff]  ;;  %v637_v24 = vld [vmem:[%s3881_s1 + $0x4d8] sm:$0xff]  ;;  %v636_v28 = vld [vmem:[%s3881_s1 + $0x4d0] sm:$0xff] }
  0x4a   : > { %2273 = vmatprep.subr.mxu1 %v602_v33  ;;  %2239 = vmatpush3.msra.mxu0 %v554_v34  ;;  %v654_v23 = vld [vmem:[%s3881_s1 + $0x560] sm:$0xff]  ;;  %v669_v25 = vld [vmem:[%s3881_s1 + $0x5d8] sm:$0xff]  ;;  %v668_v29 = vld [vmem:[%s3881_s1 + $0x5d0] sm:$0xff] }
  0x4b   : > { %2274 = vmatpush3.msra.mxu1 %v586_v35  ;;  %2240 = vmatprep.subr.mxu0 %v569_v36  ;;  %v621_v26 = vld [vmem:[%s3881_s1 + $0x458] sm:$0xff]  ;;  %v620_v30 = vld [vmem:[%s3881_s1 + $0x450] sm:$0xff]  ;;  %v635_v32 = vld [vmem:[%s3881_s1 + $0x4c8] sm:$0xff] }
  0x4c   : > { %2275 = vmatprep.subr.mxu1 %v601_v37  ;;  %2241 = vmatpush3.msra.mxu0 %v553_v38  ;;  %v653_v27 = vld [vmem:[%s3881_s1 + $0x558] sm:$0xff]  ;;  %v652_v31 = vld [vmem:[%s3881_s1 + $0x550] sm:$0xff]  ;;  %v667_v33 = vld [vmem:[%s3881_s1 + $0x5c8] sm:$0xff] }
  0x4d   : > { %2276 = vmatpush3.msra.mxu1 %v585_v39  ;;  %2242 = vmatprep.subr.mxu0 %v568_v40  ;;  %v619_v34 = vld [vmem:[%s3881_s1 + $0x448] sm:$0xff]  ;;  %v634_v36 = vld [vmem:[%s3881_s1 + $0x4c0] sm:$0xff]  ;;  %v633_v40 = vld [vmem:[%s3881_s1 + $0x4b8] sm:$0xff] }
  0x4e   : > { %2277 = vmatprep.subr.mxu1 %v600_v41  ;;  %2243 = vmatpush3.msra.mxu0 %v552_v42  ;;  %v651_v35 = vld [vmem:[%s3881_s1 + $0x548] sm:$0xff]  ;;  %v666_v37 = vld [vmem:[%s3881_s1 + $0x5c0] sm:$0xff]  ;;  %v665_v41 = vld [vmem:[%s3881_s1 + $0x5b8] sm:$0xff] }
  0x4f   : > { %2278 = vmatpush3.msra.mxu1 %v584_v43  ;;  %2244 = vmatprep.subr.mxu0 %v567_v44  ;;  %v618_v38 = vld [vmem:[%s3881_s1 + $0x440] sm:$0xff]  ;;  %v617_v42 = vld [vmem:[%s3881_s1 + $0x438] sm:$0xff]  ;;  %v632_v44 = vld [vmem:[%s3881_s1 + $0x4b0] sm:$0xff] }
  0x50   : > { %2279 = vmatprep.subr.mxu1 %v599_v45  ;;  %2245 = vmatpush3.msra.mxu0 %v551_v46  ;;  %v650_v39 = vld [vmem:[%s3881_s1 + $0x540] sm:$0xff]  ;;  %v649_v43 = vld [vmem:[%s3881_s1 + $0x538] sm:$0xff]  ;;  %v664_v45 = vld [vmem:[%s3881_s1 + $0x5b0] sm:$0xff] }
  0x51   : > { %2280 = vmatpush3.msra.mxu1 %v583_v47  ;;  %2246 = vmatprep.subr.mxu0 %v566_v48  ;;  %v616_v46 = vld [vmem:[%s3881_s1 + $0x430] sm:$0xff]  ;;  %v631_v48 = vld [vmem:[%s3881_s1 + $0x4a8] sm:$0xff] }
  0x52   : > { %2281 = vmatprep.subr.mxu1 %v598_v49  ;;  %2247 = vmatpush3.msra.mxu0 %v550_v50  ;;  %v648_v47 = vld [vmem:[%s3881_s1 + $0x530] sm:$0xff]  ;;  %v663_v49 = vld [vmem:[%s3881_s1 + $0x5a8] sm:$0xff] }
  0x53   : > { %2282 = vmatpush3.msra.mxu1 %v582_v51  ;;  %2248 = vmatprep.subr.mxu0 %v565_v52  ;;  %v615_v50 = vld [vmem:[%s3881_s1 + $0x428] sm:$0xff]  ;;  %v630_v52 = vld [vmem:[%s3881_s1 + $0x4a0] sm:$0xff] }
  0x54   : > { %2283 = vmatprep.subr.mxu1 %v597_v53  ;;  %2249 = vmatpush3.msra.mxu0 %v549_v54  ;;  %v647_v51 = vld [vmem:[%s3881_s1 + $0x528] sm:$0xff]  ;;  %v662_v53 = vld [vmem:[%s3881_s1 + $0x5a0] sm:$0xff] }
  0x55   : > { %2284 = vmatpush3.msra.mxu1 %v581_v55  ;;  %2250 = vmatprep.subr.mxu0 %v564_v56  ;;  %v614_v54 = vld [vmem:[%s3881_s1 + $0x420] sm:$0xff]  ;;  %v629_v56 = vld [vmem:[%s3881_s1 + $0x498] sm:$0xff] }
  0x56   : > { %2285 = vmatprep.subr.mxu1 %v596_v57  ;;  %2251 = vmatpush3.msra.mxu0 %v548_v58  ;;  %v646_v55 = vld [vmem:[%s3881_s1 + $0x520] sm:$0xff]  ;;  %v661_v57 = vld [vmem:[%s3881_s1 + $0x598] sm:$0xff] }
  0x57   : > { %2286 = vmatpush3.msra.mxu1 %v580_v59  ;;  %2252 = vmatprep.subr.mxu0 %v563_v60  ;;  %v613_v58 = vld [vmem:[%s3881_s1 + $0x418] sm:$0xff]  ;;  %v628_v60 = vld [vmem:[%s3881_s1 + $0x490] sm:$0xff] }
  0x58   : > { %2287 = vmatprep.subr.mxu1 %v595_v61  ;;  %2253 = vmatpush3.msra.mxu0 %v547_v62  ;;  %v645_v59 = vld [vmem:[%s3881_s1 + $0x518] sm:$0xff]  ;;  %v660_v61 = vld [vmem:[%s3881_s1 + $0x590] sm:$0xff] }
  0x59   : > { %2288 = vmatpush3.msra.mxu1 %v579_v63  ;;  %2254 = vmatprep.subr.mxu0 %v562_v0  ;;  %v612_v62 = vld [vmem:[%s3881_s1 + $0x410] sm:$0xff]  ;;  %v627_v0 = vld [vmem:[%s3881_s1 + $0x488] sm:$0xff] }
  0x5a   : > { %2289 = vmatprep.subr.mxu1 %v594_v1  ;;  %2255 = vmatpush3.msra.mxu0 %v546_v2  ;;  %v644_v63 = vld [vmem:[%s3881_s1 + $0x510] sm:$0xff]  ;;  %v659_v1 = vld [vmem:[%s3881_s1 + $0x588] sm:$0xff] }
  0x5b   : > { %943 = vmatprep.mubr.f32.mxu0 %v471_v3  ;;  %2290 = vmatpush3.msra.mxu1 %v578_v4  ;;  %v611_v2 = vld [vmem:[%s3881_s1 + $0x408] sm:$0xff]  ;;  %v626_v4 = vld [vmem:[%s3881_s1 + $0x480] sm:$0xff] }
  0x5c   : > { %944 = vmatmul.mubr.f32.vlgmr.msra.gmra.mxu0 %v470_v5  ;;  %1013 = vmatprep.mubr.f32.mxu1 %v473_v6  ;;  %v643_v3 = vld [vmem:[%s3881_s1 + $0x508] sm:$0xff]  ;;  %v658_v5 = vld [vmem:[%s3881_s1 + $0x580] sm:$0xff] }
  0x5d   : > { %2294 = vmatprep.subr.mxu0 %v641_v7  ;;  %2329 = vmatprep.subr.mxu1 %v673_v8  ;;  %v610_v6 = vld [vmem:[%s3881_s1 + $0x400] sm:$0xff]  ;;  %v475_v7 = vld [vmem:[%s3036_s16 + $0x48] sm:$0xff] }
  0x5e   : > { %1014 = vmatmul.mubr.f32.vlgmr.msra.gmra.mxu1 %v472_v9  ;;  %2295 = vmatpush3.msra.mxu0 %v625_v10  ;;  %v642_v8 = vld [vmem:[%s3881_s1 + $0x500] sm:$0xff]  ;;  %v477_v10 = vld [vmem:[%s3036_s16 + $0x58] sm:$0xff] }
  0x5f   : > { %2330 = vmatpush3.msra.mxu1 %v657_v11  ;;  %2296 = vmatprep.subr.mxu0 %v640_v12  ;;  %v474_v9 = vld [vmem:[%s3036_s16 + $0x40] sm:$0xff]  ;;  %v705_v11 = vld [vmem:[%s3881_s1 + $0x6f8] sm:$0xff] }
  0x60   : > { %2331 = vmatprep.subr.mxu1 %v672_v13  ;;  %2297 = vmatpush3.msra.mxu0 %v624_v14  ;;  %v737_v12 = vld [vmem:[%s3881_s1 + $0x7f8] sm:$0xff]  ;;  %v476_v13 = vld [vmem:[%s3036_s16 + $0x50] sm:$0xff] }
  0x61   : > { %2332 = vmatpush3.msra.mxu1 %v656_v15  ;;  %2298 = vmatprep.subr.mxu0 %v639_v16  ;;  %v689_v14 = vld [vmem:[%s3881_s1 + $0x678] sm:$0xff]  ;;  %v704_v16 = vld [vmem:[%s3881_s1 + $0x6f0] sm:$0xff] }
  0x62   : > { %2333 = vmatprep.subr.mxu1 %v671_v17  ;;  %2299 = vmatpush3.msra.mxu0 %v623_v18  ;;  %v721_v15 = vld [vmem:[%s3881_s1 + $0x778] sm:$0xff]  ;;  %v736_v17 = vld [vmem:[%s3881_s1 + $0x7f0] sm:$0xff] }
  0x63   : > { %2334 = vmatpush3.msra.mxu1 %v655_v19  ;;  %2300 = vmatprep.subr.mxu0 %v638_v20  ;;  %v688_v18 = vld [vmem:[%s3881_s1 + $0x670] sm:$0xff]  ;;  %v703_v20 = vld [vmem:[%s3881_s1 + $0x6e8] sm:$0xff] }
  0x64   : > { %2335 = vmatprep.subr.mxu1 %v670_v21  ;;  %2301 = vmatpush3.msra.mxu0 %v622_v22  ;;  %v720_v19 = vld [vmem:[%s3881_s1 + $0x770] sm:$0xff]  ;;  %v735_v21 = vld [vmem:[%s3881_s1 + $0x7e8] sm:$0xff] }
  0x65   : > { %2336 = vmatpush3.msra.mxu1 %v654_v23  ;;  %2302 = vmatprep.subr.mxu0 %v637_v24  ;;  %v687_v22 = vld [vmem:[%s3881_s1 + $0x668] sm:$0xff]  ;;  %v702_v24 = vld [vmem:[%s3881_s1 + $0x6e0] sm:$0xff] }
  0x66   : > { %2337 = vmatprep.subr.mxu1 %v669_v25  ;;  %2303 = vmatpush3.msra.mxu0 %v621_v26  ;;  %v719_v23 = vld [vmem:[%s3881_s1 + $0x768] sm:$0xff]  ;;  %v734_v25 = vld [vmem:[%s3881_s1 + $0x7e0] sm:$0xff] }
  0x67   : > { %2338 = vmatpush3.msra.mxu1 %v653_v27  ;;  %2304 = vmatprep.subr.mxu0 %v636_v28  ;;  %v686_v26 = vld [vmem:[%s3881_s1 + $0x660] sm:$0xff]  ;;  %v701_v28 = vld [vmem:[%s3881_s1 + $0x6d8] sm:$0xff] }
  0x68   : > { %2339 = vmatprep.subr.mxu1 %v668_v29  ;;  %2305 = vmatpush3.msra.mxu0 %v620_v30  ;;  %v718_v27 = vld [vmem:[%s3881_s1 + $0x760] sm:$0xff]  ;;  %v733_v29 = vld [vmem:[%s3881_s1 + $0x7d8] sm:$0xff] }
  0x69   : > { %2340 = vmatpush3.msra.mxu1 %v652_v31  ;;  %2306 = vmatprep.subr.mxu0 %v635_v32  ;;  %v685_v30 = vld [vmem:[%s3881_s1 + $0x658] sm:$0xff]  ;;  %v700_v32 = vld [vmem:[%s3881_s1 + $0x6d0] sm:$0xff] }
  0x6a   : > { %2341 = vmatprep.subr.mxu1 %v667_v33  ;;  %2307 = vmatpush3.msra.mxu0 %v619_v34  ;;  %v717_v31 = vld [vmem:[%s3881_s1 + $0x758] sm:$0xff]  ;;  %v732_v33 = vld [vmem:[%s3881_s1 + $0x7d0] sm:$0xff] }
  0x6b   : > { %2342 = vmatpush3.msra.mxu1 %v651_v35  ;;  %2308 = vmatprep.subr.mxu0 %v634_v36  ;;  %v684_v34 = vld [vmem:[%s3881_s1 + $0x650] sm:$0xff]  ;;  %v699_v36 = vld [vmem:[%s3881_s1 + $0x6c8] sm:$0xff] }
  0x6c   : > { %2343 = vmatprep.subr.mxu1 %v666_v37  ;;  %2309 = vmatpush3.msra.mxu0 %v618_v38  ;;  %v716_v35 = vld [vmem:[%s3881_s1 + $0x750] sm:$0xff]  ;;  %v731_v37 = vld [vmem:[%s3881_s1 + $0x7c8] sm:$0xff] }
  0x6d   : > { %2344 = vmatpush3.msra.mxu1 %v650_v39  ;;  %2310 = vmatprep.subr.mxu0 %v633_v40  ;;  %v683_v38 = vld [vmem:[%s3881_s1 + $0x648] sm:$0xff]  ;;  %v698_v40 = vld [vmem:[%s3881_s1 + $0x6c0] sm:$0xff] }
  0x6e   : > { %2345 = vmatprep.subr.mxu1 %v665_v41  ;;  %2311 = vmatpush3.msra.mxu0 %v617_v42  ;;  %v715_v39 = vld [vmem:[%s3881_s1 + $0x748] sm:$0xff]  ;;  %v730_v41 = vld [vmem:[%s3881_s1 + $0x7c0] sm:$0xff] }
  0x6f   : > { %2346 = vmatpush3.msra.mxu1 %v649_v43  ;;  %2312 = vmatprep.subr.mxu0 %v632_v44  ;;  %v682_v42 = vld [vmem:[%s3881_s1 + $0x640] sm:$0xff]  ;;  %v697_v44 = vld [vmem:[%s3881_s1 + $0x6b8] sm:$0xff] }
  0x70   : > { %2347 = vmatprep.subr.mxu1 %v664_v45  ;;  %2313 = vmatpush3.msra.mxu0 %v616_v46  ;;  %v714_v43 = vld [vmem:[%s3881_s1 + $0x740] sm:$0xff]  ;;  %v729_v45 = vld [vmem:[%s3881_s1 + $0x7b8] sm:$0xff] }
  0x71   : > { %2348 = vmatpush3.msra.mxu1 %v648_v47  ;;  %2314 = vmatprep.subr.mxu0 %v631_v48  ;;  %v681_v46 = vld [vmem:[%s3881_s1 + $0x638] sm:$0xff]  ;;  %v696_v48 = vld [vmem:[%s3881_s1 + $0x6b0] sm:$0xff] }
  0x72   : > { %2349 = vmatprep.subr.mxu1 %v663_v49  ;;  %2315 = vmatpush3.msra.mxu0 %v615_v50  ;;  %v713_v47 = vld [vmem:[%s3881_s1 + $0x738] sm:$0xff]  ;;  %v728_v49 = vld [vmem:[%s3881_s1 + $0x7b0] sm:$0xff] }
  0x73   : > { %2350 = vmatpush3.msra.mxu1 %v647_v51  ;;  %2316 = vmatprep.subr.mxu0 %v630_v52  ;;  %v680_v50 = vld [vmem:[%s3881_s1 + $0x630] sm:$0xff]  ;;  %v695_v52 = vld [vmem:[%s3881_s1 + $0x6a8] sm:$0xff] }
  0x74   : > { %2351 = vmatprep.subr.mxu1 %v662_v53  ;;  %2317 = vmatpush3.msra.mxu0 %v614_v54  ;;  %v712_v51 = vld [vmem:[%s3881_s1 + $0x730] sm:$0xff]  ;;  %v727_v53 = vld [vmem:[%s3881_s1 + $0x7a8] sm:$0xff] }
  0x75   : > { %2352 = vmatpush3.msra.mxu1 %v646_v55  ;;  %2318 = vmatprep.subr.mxu0 %v629_v56  ;;  %v679_v54 = vld [vmem:[%s3881_s1 + $0x628] sm:$0xff]  ;;  %v694_v56 = vld [vmem:[%s3881_s1 + $0x6a0] sm:$0xff] }
  0x76   : > { %2353 = vmatprep.subr.mxu1 %v661_v57  ;;  %2319 = vmatpush3.msra.mxu0 %v613_v58  ;;  %v711_v55 = vld [vmem:[%s3881_s1 + $0x728] sm:$0xff]  ;;  %v726_v57 = vld [vmem:[%s3881_s1 + $0x7a0] sm:$0xff] }
  0x77   : > { %2354 = vmatpush3.msra.mxu1 %v645_v59  ;;  %2320 = vmatprep.subr.mxu0 %v628_v60  ;;  %v678_v58 = vld [vmem:[%s3881_s1 + $0x620] sm:$0xff]  ;;  %v693_v60 = vld [vmem:[%s3881_s1 + $0x698] sm:$0xff] }
  0x78   : > { %2355 = vmatprep.subr.mxu1 %v660_v61  ;;  %2321 = vmatpush3.msra.mxu0 %v612_v62  ;;  %v710_v59 = vld [vmem:[%s3881_s1 + $0x720] sm:$0xff]  ;;  %v725_v61 = vld [vmem:[%s3881_s1 + $0x798] sm:$0xff] }
  0x79   : > { %2356 = vmatpush3.msra.mxu1 %v644_v63  ;;  %2322 = vmatprep.subr.mxu0 %v627_v0  ;;  %v677_v62 = vld [vmem:[%s3881_s1 + $0x618] sm:$0xff]  ;;  %v692_v0 = vld [vmem:[%s3881_s1 + $0x690] sm:$0xff] }
  0x7a   : > { %2357 = vmatprep.subr.mxu1 %v659_v1  ;;  %2323 = vmatpush3.msra.mxu0 %v611_v2  ;;  %v709_v63 = vld [vmem:[%s3881_s1 + $0x718] sm:$0xff]  ;;  %v724_v1 = vld [vmem:[%s3881_s1 + $0x790] sm:$0xff] }
  0x7b   : > { %2358 = vmatpush3.msra.mxu1 %v643_v3  ;;  %2324 = vmatprep.subr.mxu0 %v626_v4  ;;  %v676_v2 = vld [vmem:[%s3881_s1 + $0x610] sm:$0xff]  ;;  %v691_v4 = vld [vmem:[%s3881_s1 + $0x688] sm:$0xff] }
  0x7c   : > { %2359 = vmatprep.subr.mxu1 %v658_v5  ;;  %2325 = vmatpush3.msra.mxu0 %v610_v6  ;;  %v708_v3 = vld [vmem:[%s3881_s1 + $0x710] sm:$0xff]  ;;  %v723_v5 = vld [vmem:[%s3881_s1 + $0x788] sm:$0xff] }
  0x7d   : > { %1083 = vmatprep.mubr.f32.mxu0 %v475_v7  ;;  %2360 = vmatpush3.msra.mxu1 %v642_v8  ;;  %v675_v6 = vld [vmem:[%s3881_s1 + $0x608] sm:$0xff]  ;;  %v690_v8 = vld [vmem:[%s3881_s1 + $0x680] sm:$0xff] }
  0x7e   : > { %1084 = vmatmul.mubr.f32.vlgmr.msra.gmra.mxu0 %v474_v9  ;;  %1153 = vmatprep.mubr.f32.mxu1 %v477_v10  ;;  %v707_v7 = vld [vmem:[%s3881_s1 + $0x708] sm:$0xff]  ;;  %v722_v9 = vld [vmem:[%s3881_s1 + $0x780] sm:$0xff] }
  0x7f   : > { %2364 = vmatprep.subr.mxu0 %v705_v11  ;;  %2399 = vmatprep.subr.mxu1 %v737_v12  ;;  %v674_v10 = vld [vmem:[%s3881_s1 + $0x600] sm:$0xff]  ;;  %v479_v11 = vld [vmem:[%s3036_s16 + $0x68] sm:$0xff] }
  0x80   : > { %1154 = vmatmul.mubr.f32.vlgmr.msra.gmra.mxu1 %v476_v13  ;;  %2365 = vmatpush3.msra.mxu0 %v689_v14  ;;  %v706_v12 = vld [vmem:[%s3881_s1 + $0x700] sm:$0xff]  ;;  %v481_v13 = vld [vmem:[%s3036_s16 + $0x78] sm:$0xff] }
  0x81   : > { %2400 = vmatpush3.msra.mxu1 %v721_v15  ;;  %2366 = vmatprep.subr.mxu0 %v704_v16  ;;  %v478_v14 = vld [vmem:[%s3036_s16 + $0x60] sm:$0xff]  ;;  %v480_v15 = vld [vmem:[%s3036_s16 + $0x70] sm:$0xff]  ;;  %s460_s16 = scalar_lea.vmem [#allocation2], %s2859_s22 }
  0x82   : > { %2401 = vmatprep.subr.mxu1 %v736_v17  ;;  %2367 = vmatpush3.msra.mxu0 %v688_v18 }
  0x83   : > { %2402 = vmatpush3.msra.mxu1 %v720_v19  ;;  %2368 = vmatprep.subr.mxu0 %v703_v20 }
  0x84   : > { %2403 = vmatprep.subr.mxu1 %v735_v21  ;;  %2369 = vmatpush3.msra.mxu0 %v687_v22  ;;  %v738_v21 = vld [vmem:[%s3882_s2] sm:$0xff] }
  0x85   : > { %2404 = vmatpush3.msra.mxu1 %v719_v23  ;;  %2370 = vmatprep.subr.mxu0 %v702_v24 }
  0x86   : > { %2405 = vmatprep.subr.mxu1 %v734_v25  ;;  %2371 = vmatpush3.msra.mxu0 %v686_v26 }
  0x87   : > { %2406 = vmatpush3.msra.mxu1 %v718_v27  ;;  %2372 = vmatprep.subr.mxu0 %v701_v28 }
  0x88   : > { %2407 = vmatprep.subr.mxu1 %v733_v29  ;;  %2373 = vmatpush3.msra.mxu0 %v685_v30 }
  0x89   : > { %2408 = vmatpush3.msra.mxu1 %v717_v31  ;;  %2374 = vmatprep.subr.mxu0 %v700_v32 }
  0x8a   : > { %2409 = vmatprep.subr.mxu1 %v732_v33  ;;  %2375 = vmatpush3.msra.mxu0 %v684_v34 }
  0x8b   : > { %2410 = vmatpush3.msra.mxu1 %v716_v35  ;;  %2376 = vmatprep.subr.mxu0 %v699_v36 }
  0x8c   : > { %2411 = vmatprep.subr.mxu1 %v731_v37  ;;  %2377 = vmatpush3.msra.mxu0 %v683_v38 }
  0x8d   : > { %2412 = vmatpush3.msra.mxu1 %v715_v39  ;;  %2378 = vmatprep.subr.mxu0 %v698_v40 }
  0x8e   : > { %2413 = vmatprep.subr.mxu1 %v730_v41  ;;  %2379 = vmatpush3.msra.mxu0 %v682_v42 }
  0x8f   : > { %2414 = vmatpush3.msra.mxu1 %v714_v43  ;;  %2380 = vmatprep.subr.mxu0 %v697_v44 }
  0x90   : > { %2415 = vmatprep.subr.mxu1 %v729_v45  ;;  %2381 = vmatpush3.msra.mxu0 %v681_v46 }
  0x91   : > { %2416 = vmatpush3.msra.mxu1 %v713_v47  ;;  %2382 = vmatprep.subr.mxu0 %v696_v48 }
  0x92   : > { %2417 = vmatprep.subr.mxu1 %v728_v49  ;;  %2383 = vmatpush3.msra.mxu0 %v680_v50 }
  0x93   : > { %2418 = vmatpush3.msra.mxu1 %v712_v51  ;;  %2384 = vmatprep.subr.mxu0 %v695_v52 }
  0x94   : > { %2419 = vmatprep.subr.mxu1 %v727_v53  ;;  %2385 = vmatpush3.msra.mxu0 %v679_v54 }
  0x95   : > { %2420 = vmatpush3.msra.mxu1 %v711_v55  ;;  %2386 = vmatprep.subr.mxu0 %v694_v56 }
  0x96   : > { %2421 = vmatprep.subr.mxu1 %v726_v57  ;;  %2387 = vmatpush3.msra.mxu0 %v678_v58 }
  0x97   : > { %2422 = vmatpush3.msra.mxu1 %v710_v59  ;;  %2388 = vmatprep.subr.mxu0 %v693_v60 }
  0x98   : > { %2423 = vmatprep.subr.mxu1 %v725_v61  ;;  %2389 = vmatpush3.msra.mxu0 %v677_v62 }
  0x99   : > { %2424 = vmatpush3.msra.mxu1 %v709_v63  ;;  %2390 = vmatprep.subr.mxu0 %v692_v0 }
  0x9a   : > { %2425 = vmatprep.subr.mxu1 %v724_v1  ;;  %2391 = vmatpush3.msra.mxu0 %v676_v2 }
  0x9b   : > { %2426 = vmatpush3.msra.mxu1 %v708_v3  ;;  %2392 = vmatprep.subr.mxu0 %v691_v4 }
  0x9c   : > { %2427 = vmatprep.subr.mxu1 %v723_v5  ;;  %2393 = vmatpush3.msra.mxu0 %v675_v6 }
  0x9d   : > { %2428 = vmatpush3.msra.mxu1 %v707_v7  ;;  %2394 = vmatprep.subr.mxu0 %v690_v8 }
  0x9e   : > { %2429 = vmatprep.subr.mxu1 %v722_v9  ;;  %2395 = vmatpush3.msra.mxu0 %v674_v10 }
  0x9f   : > { %1223 = vmatprep.mubr.f32.mxu0 %v479_v11  ;;  %2430 = vmatpush3.msra.mxu1 %v706_v12 }
  0xa0   : > { %1293 = vmatprep.mubr.f32.mxu1 %v481_v13  ;;  %1224 = vmatmul.mubr.f32.vlgmr.msra.gmra.mxu0 %v478_v14 }
  0xa1   : > { %1294 = vmatmul.mubr.f32.vlgmr.msra.gmra.mxu1 %v480_v15 }
  0xfa   : > { %v2186_v16 = vpop.f32.mrf.mxu0 }
  0xfc   : > { %v2221_v17 = vpop.f32.mrf.mxu1  ;;  %v2187_v18 = vpop.f32.mrf.mxu0 }
  0xfd   : > { %v2188_v20 = vadd.f32 %v2187_v18, %v2186_v16 }
  0xfe   : > { %v2222_v22 = vpop.f32.mrf.mxu1 }
  0xff   : > { %v806_v25 = vadd.f32 %v2188_v20, %v738_v21  ;;  %v2223_v26 = vadd.f32 %v2222_v22, %v2221_v17 }
 0x101   : > { %v876_v30 = vadd.f32 %v2223_v26, %v806_v25 }
 0x11c   : > { %v2256_v19 = vpop.f32.mrf.mxu0 }
 0x11e   : > { %v2291_v23 = vpop.f32.mrf.mxu1  ;;  %v2257_v24 = vpop.f32.mrf.mxu0 }
 0x11f   : > { %v2258_v28 = vadd.f32 %v2257_v24, %v2256_v19 }
 0x120   : > { %v2292_v29 = vpop.f32.mrf.mxu1 }
 0x121   : > { %v946_v33 = vadd.f32 %v2258_v28, %v876_v30  ;;  %v2293_v34 = vadd.f32 %v2292_v29, %v2291_v23 }
 0x123   : > { %v1016_v37 = vadd.f32 %v2293_v34, %v946_v33 }
 0x13e   : > { %v2326_v27 = vpop.f32.mrf.mxu0 }
 0x140   : > { %v2361_v31 = vpop.f32.mrf.mxu1  ;;  %v2327_v32 = vpop.f32.mrf.mxu0 }
 0x141   : > { %v2328_v35 = vadd.f32 %v2327_v32, %v2326_v27 }
 0x142   : > { %v2362_v36 = vpop.f32.mrf.mxu1 }
 0x143   : > { %v1086_v38 = vadd.f32 %v2328_v35, %v1016_v37  ;;  %v2363_v39 = vadd.f32 %v2362_v36, %v2361_v31 }
 0x145   : > { %v1156_v44 = vadd.f32 %v2363_v39, %v1086_v38 }
 0x160   : > { %v2396_v40 = vpop.f32.mrf.mxu0 }
 0x161   : > { %v2431_v41 = vpop.f32.mrf.mxu1 }
 0x162   : > { %v2397_v42 = vpop.f32.mrf.mxu0 }
 0x163   : > { %v2432_v43 = vpop.f32.mrf.mxu1  ;;  %v2398_v45 = vadd.f32 %v2397_v42, %v2396_v40 }
 0x164   : > { %v2433_v47 = vadd.f32 %v2432_v43, %v2431_v41 }
 0x165   : > { %v1226_v46 = vadd.f32 %v2398_v45, %v1156_v44 }
 0x167   : > { %v1296_v48 = vadd.f32 %v2433_v47, %v1226_v46  }
 0x168 LB: >> { %v1309_v49 = vld [vmem:[%s3883_s3 + $0x18] sm:$0xff]  ;;  %v2715_v50 = vmov 0.0   ;;  %v1308_v51 = vld [vmem:[%s3883_s3 + $0x10] sm:$0xff]  ;;  %vm2716_vm0 = vmmov 0   ;;  %v1307_v52 = vld [vmem:[%s3883_s3 + $0x8] sm:$0xff]  ;;  %vm1310_vm1 = vcmask 261120   ;;  %s2713_s18 = sphi %s3654_s18, %s1304_s18   ;;  %v2709_v48 = vphi %v1296_v48, %v3910_v48  }
 0x169   : >> { %2474 = vmatprep.subr.mxu1 %v2715_v50  ;;  %2482 = vmatprep.mubr.msk.f32.mxu1 %vm2716_vm0, %v2715_v50  ;;  %v1306_v53 = vld [vmem:[%s3883_s3] sm:$0xff]  ;;  %s2717_s27 = smov 112   ;;  %s2718_s28 = smov 96   ;;  %vm1387_vm2 = vcmask 130048   ;;  %vm1462_vm3 = vcmask 64512   ;;  %v1723_v19 = vld [vmem:[%s3884_s4 + $0x18] sm:$0xff] }
 0x16a   : >> { %2475 = vmatpush3.msra.mxu1 %v1309_v49  ;;  %2495 = vmatprep.subr.mxu0 %v2715_v50  ;;  %s2719_s20 = smov 80   ;;  %s2720_s24 = smov 48   ;;  %v1722_v20 = vld [vmem:[%s3884_s4 + $0x10] sm:$0xff]  ;;  %v1721_v21 = vld [vmem:[%s3884_s4 + $0x8] sm:$0xff]  ;;  %v1720_v22 = vld [vmem:[%s3884_s4] sm:$0xff] }
 0x16b   : >> { %2476 = vmatprep.subr.mxu1 %v2715_v50  ;;  %2497 = vmatprep.mubr.msk.f32.mxu0 %vm2716_vm0, %v2715_v50  ;;  %s2721_s25 = smov 64   ;;  %v2140_v29 = vld [vmem:[%s3885_s5] ss:$0 sm:$0xff]  ;;  %v1838_v40 = vld [vmem:[%s3888_s8 + $0x18] sm:$0xff]  ;;  %v1837_v41 = vld [vmem:[%s3888_s8 + $0x10] sm:$0xff]  ;;  %s1304_s18 = sadd.s32 1, %s2713_s18  }
 0x16c   : >> { %2477 = vmatpush3.msra.mxu1 %v1308_v51  ;;  %v1836_v42 = vld [vmem:[%s3888_s8 + $0x8] sm:$0xff]  ;;  %v1835_v43 = vld [vmem:[%s3888_s8] sm:$0xff]  ;;  %v1935_v44 = vld [vmem:[%s3890_s10 + $0x78] sm:$0xff]  ;;  %p1301_p11 = scmp.ge.s32.totalorder %s1304_s18, 2  }
 0x16d   : >> { %2478 = vmatprep.subr.mxu1 %v2715_v50  ;;  %v1934_v45 = vld [vmem:[%s3890_s10 + $0x70] sm:$0xff]  ;;  %v1933_v46 = vld [vmem:[%s3890_s10 + $0x68] sm:$0xff]  ;;  %v1932_v47 = vld [vmem:[%s3890_s10 + $0x60] sm:$0xff]  ;;  %s2150_s19 = sshll.u32 (%p1301_p11), %s2820_s17, 7  ;;  %s2723_s21 = smov (%p1301_p11), [#allocation2]  }
 0x16e   : >> { %2479 = vmatpush3.msra.mxu1 %v1307_v52  ;;  %v1930_v49 = vld [vmem:[%s3890_s10 + $0x50] sm:$0xff]  ;;  %v1929_v51 = vld [vmem:[%s3890_s10 + $0x48] sm:$0xff]  ;;  %v1928_v52 = vld [vmem:[%s3890_s10 + $0x40] sm:$0xff]  ;;  %s2641_s15 = sshll.u32 (%p1301_p11), %s2723_s21, 4  ;;  %s2642_s15 = int_to_ptr.vmem [resolvable:$false] %s2641_s15 }
 0x16f   : >> { %2480 = vmatprep.subr.mxu1 %v2715_v50  ;;  %s2643_s29 = scalar_lea.vmem (%p1301_p11), %s2642_s15, 256 }
 0x170   : >> { %2481 = vmatpush3.msra.mxu1 %v1306_v53  ;;  %v1927_v53 = vld [vmem:[%s3890_s10 + $0x38] sm:$0xff] }
 0x171   : >> { %2483 = vmatmul.mubr.msk.f32.vlgmr.msra.gmra.mxu1 %vm1310_vm1, %v2709_v48  ;;  %2485 = vmatprep.subr.mxu1 %v2715_v50 }
 0x172   : >> { %2487 = vmatprep.mubr.msk.f32.mxu1 %vm2716_vm0, %v2715_v50 }
 0x231   : >> { %v1380_v54 = vpop.f32.mrf.mxu1 }
 0x232   : >> { %1550 = vrot.lane.b32.xlu1 %v1380_v54, %s2717_s27  ;;  %1385 = vrot.lane.b32.xlu0 %v1380_v54, %s2718_s28  ;;  %s2057_s28 = scalar_lea.hbm (%p1301_p11), %s3894_s14, %s2150_s19 }
 0x233   : >> { %v2484_v55 = vpop.f32.mrf.mxu1 }
 0x234   : >> { %v1925_v55 = vld [vmem:[%s3890_s10 + $0x28] sm:$0xff] }
 0x236   : >> { %1552 = vrot.lane.b32.xlu0 %v1380_v54, %s2719_s20  ;;  %s2059_s20 = sshll.u32 (%p1301_p11), %s460_s16, 4  ;;  %s2060_s20 = int_to_ptr.vmem [resolvable:$true] %s2059_s20 }
 0x237   : > { %s2637_s18 = scalar_lea.vmem (%p1301_p11), %s2060_s20, 128  ;;  %p2644_p1 = scmp.lt.s32.totalorder (%p1301_p11), %s2060_s20, %s2642_s15 }
 0x238   : > { %p2638_p12 = scmp.ne.s32.totalorder (%p1301_p11), %s2060_s20, %s2637_s18  ;;  %p2645_p2 = scmp.lt.s32.totalorder (%p1301_p11), %s2643_s29, %s2637_s18 }
 0x23a   : > { %p2639_p13 = pnand (%p1301_p11), %p2638_p12, %p2837_p5  ;;  %p2646_p3 = por (%p1301_p11), %p2645_p2, %p2644_p1 }
 0x23c   : > { %p2640_p0 = pneg (%p1301_p11), %p2639_p13 }
 0x23e   : > { %p2647_p4 = pnand (%p1301_p11), %p2646_p3, %p2640_p0 }
 0x2a4   : >> { %v1386_v56 = vpop.permute.xlu0 %1385  ;;  %v1551_v58 = vpop.permute.xlu1 %1550 }
 0x2a5   : >> { %2486 = vmatpush3.xpose.msk.msra.mxu1 %vm1387_vm2, %v1386_v56  ;;  %v1924_v56 = vld [vmem:[%s3890_s10 + $0x20] sm:$0xff] }
 0x2a6   : >> { %2490 = vmatprep.subr.mxu1 %v2715_v50 }
 0x2a8   : >> { %2488 = vmatmul.mubr.msk.f32.vlgmr.msra.gmra.mxu1 %vm1387_vm2, %v1380_v54  ;;  %v1553_v57 = vpop.permute.xlu0 %1552 }
 0x2a9   : >> { %2496 = vmatpush3.xpose.msk.msra.mxu0 %vm1387_vm2, %v1553_v57  ;;  %2492 = vmatprep.mubr.msk.f32.mxu1 %vm2716_vm0, %v2715_v50  ;;  %v1923_v57 = vld [vmem:[%s3890_s10 + $0x18] sm:$0xff] }
 0x2aa   : >> { %2527 = vmatprep.subr.mxu0 %v2715_v50 }
 0x2ac   : >> { %2498 = vmatmul.mubr.msk.f32.vlgmr.msra.gmra.mxu0 %vm1387_vm2, %v1551_v58 }
 0x2ad   : >> { %2559 = vmatprep.mubr.msk.f32.mxu0 %vm2716_vm0, %v2715_v50  ;;  %2528 = vmatpush3.msra.mxu0 %v1935_v44 }
 0x2ae   : >> { %2529 = vmatprep.subr.mxu0 %v2715_v50 }
 0x2af   : >> { %2530 = vmatpush3.msra.mxu0 %v1934_v45 }
 0x2b0   : >> { %2531 = vmatprep.subr.mxu0 %v2715_v50 }
 0x2b1   : >> { %2532 = vmatpush3.msra.mxu0 %v1933_v46 }
 0x2b2   : >> { %2533 = vmatprep.subr.mxu0 %v2715_v50 }
 0x2b3   : >> { %2534 = vmatpush3.msra.mxu0 %v1932_v47 }
 0x2b4   : >> { %2535 = vmatprep.subr.mxu0 %v2715_v50 }
 0x368   : >> { %v1458_v59 = vpop.f32.mrf.mxu1 }
 0x369   : >> { %v1463_v60 = vsel %vm1462_vm3, %v1458_v59, -inf }
 0x36a   : >> { %1464 = vmax.xlane.f32.xlu1 %v1463_v60  ;;  %v2489_v61 = vpop.f32.mrf.mxu1 }
 0x36c   : >> { %v1624_v62 = vpop.f32.mrf.mxu0 }
 0x36d   : >> { %v1628_v63 = vsel %vm1462_vm3, %v1624_v62, -inf }
 0x36e   : >> { %1629 = vmax.xlane.f32.xlu0 %v1628_v63  ;;  %v2499_v0 = vpop.f32.mrf.mxu0 }
 0x36f   : >> { %v2143_v0 = vld [vmem:[%s3887_s7] ss:$0 sm:$0xff] }
 0x3f3   : >> { %v1465_v1 = vpop.xlane.xlu1 %1464 }
 0x3f4   : >> { %v1466_v2 = vsub.f32 %v1458_v59, %v1465_v1 }
 0x3f6   : >> { %v1467_v3 = vmul.f32 1.442695, %v1466_v2 }
 0x3f7   : >> { %v1630_v4 = vpop.xlane.xlu0 %1629 }
 0x3f8   : >> { %2625 = vpow2.f32 %v1467_v3  ;;  %v1631_v5 = vsub.f32 %v1624_v62, %v1630_v4  ;;  %v2142_v62 = vld [vmem:[%s3886_s6] ss:$0 sm:$0xff]  ;;  %v1922_v3 = vld [vmem:[%s3890_s10 + $0x10] sm:$0xff]  ;;  %v1921_v4 = vld [vmem:[%s3890_s10 + $0x8] sm:$0xff] }
 0x3fa   : >> { %v1632_v6 = vmul.f32 1.442695, %v1631_v5  ;;  %v1920_v5 = vld [vmem:[%s3890_s10] sm:$0xff] }
 0x3fc   : >> { %2627 = vpow2.f32 %v1632_v6  ;;  %v2144_v6 = vld [vmem:[%s3889_s9] ss:$0 sm:$0xff] }
 0x405   : >> { %v2626_v7 = vpop.eup %2625 }
 0x406   : >> { %v1469_v8 = vsel %vm1462_vm3, %v2626_v7, 0.0 }
 0x407   : >> { %1470 = vadd.xlane.f32.xlu0 %v1469_v8 }
 0x409   : >> { %v2628_v9 = vpop.eup %2627 }
 0x40a   : >> { %v1634_v10 = vsel %vm1462_vm3, %v2628_v9, 0.0 }
 0x40b   : >> { %1635 = vadd.xlane.f32.xlu1 %v1634_v10 }
 0x41c   : >> { %1639 = vrot.lane.b32.xlu1 %v1380_v54, %s2720_s24  ;;  %s2722_s24 = smov 16  }
 0x41d   : >> { %1474 = vrot.lane.b32.xlu0 %v1380_v54, %s2721_s25  ;;  %v1926_v54 = vld [vmem:[%s3890_s10 + $0x30] sm:$0xff] }
 0x490   : >> { %v1471_v11 = vpop.xlane.xlu0 %1470 }
 0x491   : >> { %2629 = vrcp.f32 %v1471_v11  ;;  %v2146_v11 = vld [vmem:[%s3891_s11] ss:$0 sm:$0xff] }
 0x494   : >> { %v1475_v12 = vpop.permute.xlu0 %1474  ;;  %v1636_v13 = vpop.xlane.xlu1 %1635 }
 0x495   : >> { %2631 = vrcp.f32 %v1636_v13  ;;  %2491 = vmatpush3.msra.mxu1 %v1475_v12 }
 0x496   : >> { %2500 = vmatprep.subr.mxu1 %v2715_v50 }
 0x498   : >> { %v1640_v16 = vpop.permute.xlu1 %1639 }
 0x49e   : >> { %v2630_v14 = vpop.eup %2629 }
 0x49f   : >> { %v1473_v15 = vmul.f32 %v2630_v14, %v2626_v7 }
 0x4a1   : >> { %2493 = vmatmul.mubr.msk.f32.vlgmr.msra.gmra.mxu1 %vm1462_vm3, %v1473_v15 }
 0x4a2   : >> { %v2632_v17 = vpop.eup %2631  ;;  %2501 = vmatpush3.msra.mxu1 %v1640_v16  ;;  %2502 = vmatprep.mubr.msk.f32.mxu1 %vm2716_vm0, %v2715_v50 }
 0x4a3   : >> { %v1638_v18 = vmul.f32 %v2632_v17, %v2628_v9  ;;  %2505 = vmatprep.subr.mxu1 %v2715_v50 }
 0x4a5   : >> { %2503 = vmatmul.mubr.msk.f32.vlgmr.msra.gmra.mxu1 %vm1462_vm3, %v1638_v18 }
 0x4a6   : >> { %2513 = vmatprep.mubr.msk.f32.mxu1 %vm2716_vm0, %v2715_v50  ;;  %2506 = vmatpush3.msra.mxu1 %v1723_v19 }
 0x4a7   : >> { %2507 = vmatprep.subr.mxu1 %v2715_v50 }
 0x4a8   : >> { %2508 = vmatpush3.msra.mxu1 %v1722_v20 }
 0x4a9   : >> { %2509 = vmatprep.subr.mxu1 %v2715_v50 }
 0x4aa   : >> { %2510 = vmatpush3.msra.mxu1 %v1721_v21 }
 0x4ab   : >> { %2511 = vmatprep.subr.mxu1 %v2715_v50 }
 0x4ac   : >> { %2512 = vmatpush3.msra.mxu1 %v1720_v22 }
 0x4ad   : >> { %2516 = vmatprep.subr.mxu1 %v2715_v50 }
 0x561   : >> { %v1546_v23 = vpop.f32.mrf.mxu1 }
 0x563   : >> { %v2494_v24 = vpop.f32.mrf.mxu1 }
 0x565   : >> { %v1711_v25 = vpop.f32.mrf.mxu1 }
 0x566   : >> { %1716 = vrot.lane.b32.xlu1 %v1711_v25, %s2722_s24  ;;  %v2147_v25 = vld [vmem:[%s3892_s12] ss:$0 sm:$0xff]  ;;  %s3911_s24 = sand.u32 (%p1301_p11), 1, %s2697_s30  }
 0x567   : >> { %v2504_v26 = vpop.f32.mrf.mxu1  ;;  %s2046_s25 = scalar_lea.sflag (%p1301_p11), [#allocation3], %s3911_s24 }
 0x5d8   : >> { %v1717_v27 = vpop.permute.xlu1 %1716 }
 0x5d9   : >> { %v1719_v28 = vsel %vm1387_vm2, %v1546_v23, %v1717_v27  ;;  %v2148_v27 = vld [vmem:[%s3893_s13] ss:$0 sm:$0xff] }
 0x5da   : >> { %2514 = vmatmul.mubr.msk.f32.vlgmr.msra.gmra.mxu1 %vm1310_vm1, %v1719_v28 }
 0x5db   : >> { %2524 = vmatprep.mubr.msk.f32.mxu1 %vm2716_vm0, %v2715_v50  ;;  %2517 = vmatpush3.msra.mxu1 %v1838_v40 }
 0x5dc   : >> { %2518 = vmatprep.subr.mxu1 %v2715_v50 }
 0x5dd   : >> { %2519 = vmatpush3.msra.mxu1 %v1837_v41 }
 0x5de   : >> { %2520 = vmatprep.subr.mxu1 %v2715_v50 }
 0x5df   : >> { %2521 = vmatpush3.msra.mxu1 %v1836_v42 }
 0x5e0   : >> { %2522 = vmatprep.subr.mxu1 %v2715_v50 }
 0x5e1   : >> { %2523 = vmatpush3.msra.mxu1 %v1835_v43 }
 0x69a   : >> { %v1800_v30 = vpop.f32.mrf.mxu1 }
 0x69b   : >> { %v1801_v31 = vadd.f32 %v2140_v29, %v1800_v30 }
 0x69c   : >> { %v2515_v32 = vpop.f32.mrf.mxu1 }
 0x69d   : >> { %v1804_v33 = vadd.f32 %v2709_v48, %v1801_v31  ;;  %v1931_v48 = vld [vmem:[%s3890_s10 + $0x58] sm:$0xff] }
 0x69e   : >> { %2536 = vmatpush3.msra.mxu0 %v1931_v48 }
 0x69f   : >> { %v1805_v34 = vsel %vm1310_vm1, %v1804_v33, 0.0  ;;  %2537 = vmatprep.subr.mxu0 %v2715_v50 }
 0x6a0   : >> { %1806 = vadd.xlane.f32.xlu0 %v1805_v34  ;;  %2538 = vmatpush3.msra.mxu0 %v1930_v49 }
 0x6a1   : >> { %2539 = vmatprep.subr.mxu0 %v2715_v50 }
 0x6a2   : >> { %2540 = vmatpush3.msra.mxu0 %v1929_v51 }
 0x6a3   : >> { %2541 = vmatprep.subr.mxu0 %v2715_v50 }
 0x6a4   : >> { %2542 = vmatpush3.msra.mxu0 %v1928_v52 }
 0x6a5   : >> { %2543 = vmatprep.subr.mxu0 %v2715_v50 }
 0x6a6   : >> { %2544 = vmatpush3.msra.mxu0 %v1927_v53 }
 0x6a7   : >> { %2545 = vmatprep.subr.mxu0 %v2715_v50 }
 0x6a8   : >> { %2546 = vmatpush3.msra.mxu0 %v1926_v54 }
 0x6a9   : >> { %2547 = vmatprep.subr.mxu0 %v2715_v50 }
 0x6aa   : >> { %2548 = vmatpush3.msra.mxu0 %v1925_v55 }
 0x6ab   : >> { %2549 = vmatprep.subr.mxu0 %v2715_v50 }
 0x6ac   : >> { %2550 = vmatpush3.msra.mxu0 %v1924_v56 }
 0x6ad   : >> { %2551 = vmatprep.subr.mxu0 %v2715_v50 }
 0x6ae   : >> { %2552 = vmatpush3.msra.mxu0 %v1923_v57 }
 0x6af   : >> { %2553 = vmatprep.subr.mxu0 %v2715_v50 }
 0x6b0   : >> { %2554 = vmatpush3.msra.mxu0 %v1922_v3 }
 0x6b1   : >> { %2555 = vmatprep.subr.mxu0 %v2715_v50 }
 0x6b2   : >> { %2556 = vmatpush3.msra.mxu0 %v1921_v4 }
 0x6b3   : >> { %2557 = vmatprep.subr.mxu0 %v2715_v50 }
 0x6b4   : >> { %2558 = vmatpush3.msra.mxu0 %v1920_v5 }
 0x729   : >> { %v1807_v35 = vpop.xlane.xlu0 %1806 }
 0x72a   : >> { %v1809_v36 = vmul.f32 0.03125, %v1807_v35 }
 0x72c   : >> { %v1810_v37 = vsub.f32 %v1804_v33, %v1809_v36 }
 0x72e   : >> { %v1811_v38 = vmul.f32 %v1810_v37, %v1810_v37 }
 0x730   : >> { %v1812_v39 = vsel %vm1310_vm1, %v1811_v38, 0.0 }
 0x731   : >> { %1813 = vadd.xlane.f32.xlu1 %v1812_v39 }
 0x7ba   : >> { %v1814_v58 = vpop.xlane.xlu1 %1813 }
 0x7bb   : >> { %v1815_v59 = vmul.f32 0.03125, %v1814_v58 }
 0x7bd   : >> { %v1816_v60 = vadd.f32 1e-05, %v1815_v59 }
 0x7bf   : >> { %2633 = vrsqrt.f32 %v1816_v60 }
 0x7cc   : >> { %v2634_v61 = vpop.eup %2633 }
 0x7cd   : >> { %v1818_v63 = vmul.f32 %v2634_v61, %v1810_v37 }
 0x7cf   : >> { %v1826_v1 = vmul.f32 %v2142_v62, %v1818_v63 }
 0x7d1   : >> { %v1834_v2 = vadd.f32 %v2143_v0, %v1826_v1 }
 0x7d3   : >> { %2525 = vmatmul.mubr.msk.f32.vlgmr.msra.gmra.mxu1 %vm1310_vm1, %v1834_v2 }
 0x893   : >> { %v1915_v7 = vpop.f32.mrf.mxu1 }
 0x894   : >> { %v1916_v8 = vadd.f32 %v2144_v6, %v1915_v7 }
 0x895   : >> { %v2526_v9 = vpop.f32.mrf.mxu1 }
 0x896   : >> { %v1919_v10 = vmax.f32 %v1916_v8, 0.0 }
 0x898   : >> { %2560 = vmatmul.mubr.f32.vlgmr.msra.gmra.mxu0 %v1919_v10 }
 0x958   : >> { %v2009_v12 = vpop.f32.mrf.mxu0 }
 0x959   : >> { %v2010_v13 = vadd.f32 %v2146_v11, %v2009_v12 }
 0x95a   : >> { %v2561_v14 = vpop.f32.mrf.mxu0 }
 0x95b   : >> { %v2013_v15 = vadd.f32 %v2010_v13, %v1834_v2 }
 0x95d   : >> { %v2014_v50 = vsel %vm1310_vm1, %v2013_v15, 0.0 }
 0x95e   : >> { %2015 = vadd.xlane.f32.xlu0 %v2014_v50 }
 0x9e7   : >> { %v2016_v16 = vpop.xlane.xlu0 %2015 }
 0x9e8   : >> { %v2017_v17 = vmul.f32 0.03125, %v2016_v16 }
 0x9ea   : >> { %v2018_v18 = vsub.f32 %v2013_v15, %v2017_v17 }
 0x9ec   : >> { %v2019_v19 = vmul.f32 %v2018_v18, %v2018_v18 }
 0x9ee   : >> { %v2020_v20 = vsel %vm1310_vm1, %v2019_v19, 0.0 }
 0x9ef   : >> { %2021 = vadd.xlane.f32.xlu0 %v2020_v20 }
 0xa78   : >> { %v2022_v21 = vpop.xlane.xlu0 %2021 }
 0xa79   : >> { %v2023_v22 = vmul.f32 0.03125, %v2022_v21 }
 0xa7b   : >> { %v2024_v23 = vadd.f32 1e-05, %v2023_v22 }
 0xa7d   : >> { %2635 = vrsqrt.f32 %v2024_v23 }
 0xa8a   : >> { %v2636_v24 = vpop.eup %2635 }
 0xa8b   : >> { %v2026_v26 = vmul.f32 %v2636_v24, %v2018_v18 }
 0xa8d   : >> { %v2034_v28 = vmul.f32 %v2147_v25, %v2026_v26  ;;  %1303 = sbr.rel (!%p1301_p11) target bundleno = 360 (0x168), region = 118 }
 0xa8f   : >> { %v2042_v29 = vadd.f32 %v2148_v27, %v2034_v28  }
 0xa91   : >> { %v3910_v48 = vmov %v2042_v29  ;;  %2044 = vst.msk [vmem:[%s460_s16] sm:$0xff] (%p1301_p11), %vm1310_vm1, %v2042_v29 }
 0xa92   : > { %2650 = shalt.err (!%p2647_p4)
}
 0xa93   : > { %s2651_s17 = scalar_lea.hbm %s2057_s28, 128  ;;  %s2655_s19 = scalar_lea.hbm %s3894_s14, 256 }
 0xa94   : > { %p2652_p7 = scmp.ne.s32.totalorder %s2057_s28, %s2651_s17  ;;  %p2656_p10 = scmp.lt.s32.totalorder %s2057_s28, %s3894_s14 }
 0xa95   : > { %p2657_p11 = scmp.lt.s32.totalorder %s2655_s19, %s2651_s17 }
 0xa96   : > { %p2653_p8 = pnand %p2652_p7, %p2837_p5 }
 0xa97   : > { %p2658_p12 = por %p2657_p11, %p2656_p10 }
 0xa98   : > { %p2654_p9 = pneg %p2653_p8 }
 0xa9a   : > { %p2659_p13 = pnand %p2658_p12, %p2654_p9 }
 0xa9c   : > { %2662 = shalt.err (!%p2659_p13)
}
 0xa9d   : > { %2562 = dma.vmem_to_hbm [thread:$0]  (%p2837_p5), %s2060_s20, 128, %s2057_s28, %s2046_s25  }
 0xa9e PF: > { %s3912_s24 = sld [smem:[#allocation7_spill]] }
 0xa9f   : > { %s3913_s18 = sld [smem:[#allocation5_spill]] }
 0xaa4   : > { %p2568_p0 = scmp.ge.s32.totalorder %s3912_s24, 2 }
 0xaa5   : > { %s2071_s15 = sand.u32 1, %s3913_s18  }
 0xaa6   : > { %p2565_p1 = pnand %p2568_p0, %p2841_p6  ;;  %s2072_s29 = scalar_lea.sflag [#allocation3], %s2071_s15 }
 0xaa8   : > { %p2566_p2 = pneg %p2565_p1 }
 0xaaa   : > { %2688 = dma.done.wait (%p2566_p2), %s2072_s29, 128  }
 0xaab   : > { %2690 = vsyncadd (%p2566_p2), %s2072_s29, 4294967168  ;;  %s3915_s16 = sld [smem:[#allocation8_spill]]  ;;  %s3918_s29 = smov %s2697_s30 }
 0xaac   : > { %s3916_s17 = sld [smem:[#allocation6_spill]] }
 0xaad   : > { %s3917_s15 = sld [smem:[#allocation9_spill]] }
 0xab1   : > { %p24_p3 = scmp.ge.s32.totalorder %s3915_s16, 4  }
 0xab2   : > { %s3919_s30 = smov %s3916_s17 }
 0xab3   :  { %26 = sbr.rel (!%p24_p3) target bundleno = 3 (0x3), region = 129 }
 0xab8   :  { %2077 = vsyncpa [#allocation3], 1 }
 0xab9   :  { %2079 = vsyncpa [#allocation3 + $0x1], 1 }

</bundles_post_ra>
